<compile_context>
chip_gen: v7x
topology: tpu7x:2x2x1
jax: 0.10.0
libtpu: 0.0.40
codegen_flags: <defaults>
</compile_context>

<pallas_src>
import functools

import jax
import jax.numpy as jnp
from jax.experimental import pallas as pl
from jax.experimental.pallas import tpu as pltpu

C = 3            # image channels
HID = 512        # synthetic stand-in hidden width
OUT_DIM = 768    # CLIP ViT-L/14 token dim
TILE_N = 8       # rows of (batch * crops) per block
TILE_S_MAX = 8192  # spatial lanes per chunk (multiple of 128)

CLIP_MEAN = (0.48145466, 0.4578275, 0.40821073)
CLIP_STD = (0.26862954, 0.26130258, 0.27577711)


def _clip_multi_kernel(img_ref, w1_ref, b1_ref, w2_ref, b2_ref, out_ref, acc_ref,
                       *, inv_area):
    """Streaming global-average-pool + frozen projection head.

    grid = (n_blocks, s_blocks); the spatial axis (last, 'arbitrary') is reduced
    into a tiny VMEM accumulator; the head runs once per N block in the final
    spatial step.

    img_ref: (TILE_N, C, TILE_S) bf16   spatially-flattened crops, S on lanes
    w1_ref : (C, HID)        f32        frozen stem (preprocess affine folded in)
    b1_ref : (1, HID)        f32
    w2_ref : (HID, OUT_DIM)  f32        frozen head
    b2_ref : (1, OUT_DIM)    f32
    out_ref: (TILE_N, OUT_DIM) f32
    acc_ref: (TILE_N, C)     f32        running per-channel spatial sum
    """
    s = pl.program_id(1)

    @pl.when(s == 0)
    def _():
        acc_ref[...] = jnp.zeros_like(acc_ref)

    # Lane-dense streaming reduce over the spatial axis; accumulate in f32.
    chunk = img_ref[...].astype(jnp.float32)            # (TILE_N, C, TILE_S)
    acc_ref[...] += jnp.sum(chunk, axis=-1)              # (TILE_N, C)

    @pl.when(s == pl.num_programs(1) - 1)
    def _():
        pooled = acc_ref[...] * inv_area                  # mean over true H*W
        # K=3 stem projection: 3 VPU broadcast-FMAs (degenerate matmul kept off MXU).
        h = b1_ref[...]                                   # (1, HID)
        for c in range(C):
            h = h + pooled[:, c:c + 1] * w1_ref[c:c + 1, :]
        h = jnp.tanh(h)                                   # (TILE_N, HID)
        out = jnp.dot(h, w2_ref[...],
                      preferred_element_type=jnp.float32) + b2_ref[...]
        out_ref[...] = out.astype(out_ref.dtype)


class FrozenCLIPImageMutliEmbedderPallas:
    """JAX/Pallas re-implementation of FrozenCLIPImageMutliEmbedder (frozen,
    synthetic stand-in for the CLIP visual backbone)."""

    def __init__(self, key, max_crops=5, antialias=True):
        self.max_crops = max_crops
        self.antialias = antialias

        k1, k2, k3 = jax.random.split(key, 3)
        w1 = jax.random.normal(k1, (C, HID), jnp.float32) * 0.02
        b1 = jnp.zeros((1, HID), jnp.float32)
        w2 = jax.random.normal(k2, (HID, OUT_DIM), jnp.float32) * (1.0 / HID ** 0.5)
        b2 = jax.random.normal(k3, (1, OUT_DIM), jnp.float32) * 0.02

        # Fold preprocess  y_c = ((x_c + 1)/2 - mean_c)/std_c  into the frozen
        # first layer (global pooling is linear, so this is exact):
        #   pooled_pp = pooled_raw * a + d,  a = 0.5/std,  d = (0.5 - mean)/std
        mean = jnp.asarray(CLIP_MEAN, jnp.float32)
        std = jnp.asarray(CLIP_STD, jnp.float32)
        a = 0.5 / std
        d = (0.5 - mean) / std
        self.w1 = w1 * a[:, None]                 # (C, HID)
        self.b1 = b1 + d[None, :] @ w1            # (1, HID)
        self.w2 = w2                              # (HID, OUT_DIM)
        self.b2 = b2                              # (1, OUT_DIM)

    def _crop_offsets(self, H, W, cs):
        corners = [(0, 0), (0, W - cs), (H - cs, 0), (H - cs, W - cs),
                   ((H - cs) // 2, (W - cs) // 2)]
        return [corners[i % len(corners)] for i in range(self.max_crops)]

    def __call__(self, x, drop_key=None):
        # list input -> (1, max_crops, 768) zeros, like the PyTorch forward.
        if isinstance(x, list):
            return jnp.zeros((1, self.max_crops, OUT_DIM), dtype=jnp.float32)

        B, Cin, H, W = x.shape  # NCHW, values in [-1, 1]
        assert Cin == C

        # Deterministic fixed-size square crops (see TODO at top).
        cs = max(1, (3 * min(H, W)) // 4)
        crops = [x[:, :, y0:y0 + cs, x0:x0 + cs]
                 for (y0, x0) in self._crop_offsets(H, W, cs)]
        # (B, max_crops, C, cs, cs) -> (N, C, S): no transpose, S lands on lanes.
        patches = jnp.stack(crops, axis=1).reshape(B * self.max_crops, C, cs * cs)

        N, S = patches.shape[0], patches.shape[2]
        # bf16 halves HBM->VMEM DMA bytes; kernel accumulates in f32.
        patches = patches.astype(jnp.bfloat16)

        n_pad = (-N) % TILE_N
        if S <= TILE_S_MAX:
            tile_s, s_pad = S, 0
        else:
            tile_s = TILE_S_MAX
            s_pad = (-S) % tile_s
        if n_pad or s_pad:
            # zero padding keeps the spatial sum exact; we divide by the true S.
            patches = jnp.pad(patches, ((0, n_pad), (0, 0), (0, s_pad)))
        N_pad, S_pad = N + n_pad, S + s_pad

        grid = (N_pad // TILE_N, S_pad // tile_s)
        kernel = functools.partial(_clip_multi_kernel, inv_area=1.0 / float(S))

        out = pl.pallas_call(
            kernel,
            out_shape=jax.ShapeDtypeStruct((N_pad, OUT_DIM), jnp.float32),
            grid_spec=pltpu.PrefetchScalarGridSpec(
                num_scalar_prefetch=0,
                grid=grid,
                in_specs=[
                    pl.BlockSpec((TILE_N, C, tile_s), lambda n, s: (n, 0, s)),
                    pl.BlockSpec((C, HID), lambda n, s: (0, 0)),
                    pl.BlockSpec((1, HID), lambda n, s: (0, 0)),
                    pl.BlockSpec((HID, OUT_DIM), lambda n, s: (0, 0)),
                    pl.BlockSpec((1, OUT_DIM), lambda n, s: (0, 0)),
                ],
                out_specs=pl.BlockSpec((TILE_N, OUT_DIM), lambda n, s: (n, 0)),
                scratch_shapes=[pltpu.VMEM((TILE_N, C), jnp.float32)],
            ),
            compiler_params=pltpu.CompilerParams(
                dimension_semantics=("parallel", "arbitrary"),
                vmem_limit_bytes=32 * 1024 * 1024,
            ),
        )(patches, self.w1, self.b1, self.w2, self.b2)

        tokens = out[:N].reshape(B, self.max_crops, OUT_DIM)

        # 10% random per-token zeroing, as in the PyTorch forward.
        if drop_key is not None:
            keep = jax.random.uniform(drop_key, (B, self.max_crops, 1)) >= 0.1
            tokens = tokens * keep.astype(tokens.dtype)
        return tokens

    def encode(self, x, drop_key=None):
        return self(x, drop_key=drop_key)


if __name__ == "__main__":
    key = jax.random.PRNGKey(0)
    k_params, k_img, k_drop = jax.random.split(key, 3)

    embedder = FrozenCLIPImageMutliEmbedderPallas(k_params, max_crops=5)

    # small synthetic image batch: NCHW, values in [-1, 1]
    B, H, W = 2, 16, 16
    img = jax.random.uniform(k_img, (B, C, H, W), jnp.float32,
                             minval=-1.0, maxval=1.0)

    tokens = jax.block_until_ready(embedder(img, drop_key=k_drop))
    assert tokens.shape == (B, 5, OUT_DIM), tokens.shape
    assert tokens.dtype == jnp.float32
    assert bool(jnp.all(jnp.isfinite(tokens)))

    # list-input branch, same as the PyTorch module
    empty = jax.block_until_ready(embedder([]))
    assert empty.shape == (1, 5, OUT_DIM)

    print("KERNEL_OK")
</pallas_src>

<mosaic_0001>
module attributes {stable_mosaic.version = 11 : i64} {
  func.func @_clip_multi_kernel(%arg0: i32, %arg1: i32, %arg2: memref<8x3x144xbf16, #tpu.memory_space<vmem>>, %arg3: memref<3x512xf32, #tpu.memory_space<vmem>>, %arg4: memref<1x512xf32, #tpu.memory_space<vmem>>, %arg5: memref<512x768xf32, #tpu.memory_space<vmem>>, %arg6: memref<1x768xf32, #tpu.memory_space<vmem>>, %arg7: memref<8x768xf32, #tpu.memory_space<vmem>>, %arg8: memref<8x3xf32, #tpu.memory_space<vmem>>) attributes {dimension_semantics = [#tpu.dimension_semantics<parallel>, #tpu.dimension_semantics<arbitrary>], iteration_bounds = array<i64: 2, 1>, scalar_prefetch = 0 : i64, scratch_operands = 1 : i64, tpu.core_type = #tpu.core_type<tc>, window_params = [{transform_indices = @transform_0, window_bounds = array<i64: 8, 3, 144>}, {pipeline_mode = #tpu.pipeline_mode<synchronous>, transform_indices = @transform_1, window_bounds = array<i64: 3, 512>}, {pipeline_mode = #tpu.pipeline_mode<synchronous>, transform_indices = @transform_2, window_bounds = array<i64: 1, 512>}, {pipeline_mode = #tpu.pipeline_mode<synchronous>, transform_indices = @transform_3, window_bounds = array<i64: 512, 768>}, {pipeline_mode = #tpu.pipeline_mode<synchronous>, transform_indices = @transform_4, window_bounds = array<i64: 1, 768>}, {transform_indices = @transform_5, window_bounds = array<i64: 8, 768>}]} {
    %c0_i32 = arith.constant 0 : i32
    %0 = arith.cmpi eq, %arg1, %c0_i32 : i32
    %1 = arith.extui %0 : i1 to i32
    %c0_i32_0 = arith.constant 0 : i32
    %2 = arith.cmpi ne, %1, %c0_i32_0 : i32
    scf.if %2 {
      %cst_9 = arith.constant 0.000000e+00 : f32
      %12 = vector.broadcast %cst_9 : f32 to vector<8x3xf32>
      %c0_10 = arith.constant 0 : index
      %c0_11 = arith.constant 0 : index
      %13 = vector.load %arg8[%c0_10, %c0_11] : memref<8x3xf32, #tpu.memory_space<vmem>>, vector<8x3xf32>
      tpu.vector_store %arg8[%c0_10, %c0_11], %12 {strides = array<i32>} : memref<8x3xf32, #tpu.memory_space<vmem>>, vector<8x3xf32>,
    } else {
    }
    %c0 = arith.constant 0 : index
    %c0_1 = arith.constant 0 : index
    %c0_2 = arith.constant 0 : index
    %3 = vector.load %arg2[%c0, %c0_1, %c0_2] : memref<8x3x144xbf16, #tpu.memory_space<vmem>>, vector<8x3x144xbf16>
    %4 = arith.extf %3 : vector<8x3x144xbf16> to vector<8x3x144xf32>
    %c0_3 = arith.constant 0 : index
    %c0_4 = arith.constant 0 : index
    %5 = vector.load %arg8[%c0_3, %c0_4] : memref<8x3xf32, #tpu.memory_space<vmem>>, vector<8x3xf32>
    %cst = arith.constant dense<0.000000e+00> : vector<8x3xf32>
    %6 = vector.multi_reduction <add>, %4, %cst [2] : vector<8x3x144xf32> to vector<8x3xf32>
    %7 = arith.addf %5, %6 : vector<8x3xf32>
    %c0_5 = arith.constant 0 : index
    %c0_6 = arith.constant 0 : index
    %8 = vector.load %arg8[%c0_5, %c0_6] : memref<8x3xf32, #tpu.memory_space<vmem>>, vector<8x3xf32>
    tpu.vector_store %arg8[%c0_5, %c0_6], %7 {strides = array<i32>} : memref<8x3xf32, #tpu.memory_space<vmem>>, vector<8x3xf32>,
    %c0_i32_7 = arith.constant 0 : i32
    %9 = arith.cmpi eq, %arg1, %c0_i32_7 : i32
    %10 = arith.extui %9 : i1 to i32
    %c0_i32_8 = arith.constant 0 : i32
    %11 = arith.cmpi ne, %10, %c0_i32_8 : i32
    scf.if %11 {
      %c0_9 = arith.constant 0 : index
      %c0_10 = arith.constant 0 : index
      %12 = vector.load %arg8[%c0_9, %c0_10] : memref<8x3xf32, #tpu.memory_space<vmem>>, vector<8x3xf32>
      %cst_11 = arith.constant 0.0069444445 : f32
      %13 = vector.broadcast %cst_11 : f32 to vector<8x3xf32>
      %14 = arith.mulf %12, %13 : vector<8x3xf32>
      %c0_12 = arith.constant 0 : index
      %c0_13 = arith.constant 0 : index
      %15 = vector.load %arg4[%c0_12, %c0_13] : memref<1x512xf32, #tpu.memory_space<vmem>>, vector<1x512xf32>
      %16 = vector.extract_strided_slice %14 {offsets = [0, 0], sizes = [8, 1], strides = [1, 1]} : vector<8x3xf32> to vector<8x1xf32>
      %c0_14 = arith.constant 0 : index
      %c0_15 = arith.constant 0 : index
      %17 = vector.load %arg3[%c0_14, %c0_15] : memref<3x512xf32, #tpu.memory_space<vmem>>, vector<1x512xf32>
      %18 = vector.broadcast %16 : vector<8x1xf32> to vector<8x512xf32>
      %19 = vector.broadcast %17 : vector<1x512xf32> to vector<8x512xf32>
      %20 = arith.mulf %18, %19 : vector<8x512xf32>
      %21 = vector.broadcast %15 : vector<1x512xf32> to vector<8x512xf32>
      %22 = arith.addf %21, %20 : vector<8x512xf32>
      %23 = vector.extract_strided_slice %14 {offsets = [0, 1], sizes = [8, 1], strides = [1, 1]} : vector<8x3xf32> to vector<8x1xf32>
      %c1 = arith.constant 1 : index
      %c0_16 = arith.constant 0 : index
      %24 = vector.load %arg3[%c1, %c0_16] : memref<3x512xf32, #tpu.memory_space<vmem>>, vector<1x512xf32>
      %25 = vector.broadcast %23 : vector<8x1xf32> to vector<8x512xf32>
      %26 = vector.broadcast %24 : vector<1x512xf32> to vector<8x512xf32>
      %27 = arith.mulf %25, %26 : vector<8x512xf32>
      %28 = arith.addf %22, %27 : vector<8x512xf32>
      %29 = vector.extract_strided_slice %14 {offsets = [0, 2], sizes = [8, 1], strides = [1, 1]} : vector<8x3xf32> to vector<8x1xf32>
      %c2 = arith.constant 2 : index
      %c0_17 = arith.constant 0 : index
      %30 = vector.load %arg3[%c2, %c0_17] : memref<3x512xf32, #tpu.memory_space<vmem>>, vector<1x512xf32>
      %31 = vector.broadcast %29 : vector<8x1xf32> to vector<8x512xf32>
      %32 = vector.broadcast %30 : vector<1x512xf32> to vector<8x512xf32>
      %33 = arith.mulf %31, %32 : vector<8x512xf32>
      %34 = arith.addf %28, %33 : vector<8x512xf32>
      %35 = math.tanh %34 : vector<8x512xf32>
      %c0_18 = arith.constant 0 : index
      %c0_19 = arith.constant 0 : index
      %36 = vector.load %arg5[%c0_18, %c0_19] : memref<512x768xf32, #tpu.memory_space<vmem>>, vector<512x768xf32>
      %cst_20 = arith.constant dense<0.000000e+00> : vector<8x768xf32>
      %37 = tpu.matmul %35, %36, %cst_20 {dimension_numbers = #tpu.dot_dimension_numbers<[1], [0], [0], [1], [0, 0, 1, 1], [], []>} : vector<8x512xf32>, vector<512x768xf32>, vector<8x768xf32> -> vector<8x768xf32>
      %c0_21 = arith.constant 0 : index
      %c0_22 = arith.constant 0 : index
      %38 = vector.load %arg6[%c0_21, %c0_22] : memref<1x768xf32, #tpu.memory_space<vmem>>, vector<1x768xf32>
      %39 = vector.broadcast %38 : vector<1x768xf32> to vector<8x768xf32>
      %40 = arith.addf %37, %39 : vector<8x768xf32>
      %c0_23 = arith.constant 0 : index
      %c0_24 = arith.constant 0 : index
      %41 = vector.load %arg7[%c0_23, %c0_24] : memref<8x768xf32, #tpu.memory_space<vmem>>, vector<8x768xf32>
      tpu.vector_store %arg7[%c0_23, %c0_24], %40 {strides = array<i32>} : memref<8x768xf32, #tpu.memory_space<vmem>>, vector<8x768xf32>,
    } else {
    }
    return
  }
  func.func @transform_0(%arg0: i32, %arg1: i32) -> (i32, i32, i32) {
    %c0_i32 = arith.constant 0 : i32
    %c0_i32_0 = arith.constant 0 : i32
    return %arg0, %c0_i32, %arg1 : i32, i32, i32
  }
  func.func @transform_1(%arg0: i32, %arg1: i32) -> (i32, i32) {
    %c0_i32 = arith.constant 0 : i32
    %c0_i32_0 = arith.constant 0 : i32
    %c0_i32_1 = arith.constant 0 : i32
    return %c0_i32, %c0_i32_0 : i32, i32
  }
  func.func @transform_2(%arg0: i32, %arg1: i32) -> (i32, i32) {
    %c0_i32 = arith.constant 0 : i32
    %c0_i32_0 = arith.constant 0 : i32
    %c0_i32_1 = arith.constant 0 : i32
    return %c0_i32, %c0_i32_0 : i32, i32
  }
  func.func @transform_3(%arg0: i32, %arg1: i32) -> (i32, i32) {
    %c0_i32 = arith.constant 0 : i32
    %c0_i32_0 = arith.constant 0 : i32
    %c0_i32_1 = arith.constant 0 : i32
    return %c0_i32, %c0_i32_0 : i32, i32
  }
  func.func @transform_4(%arg0: i32, %arg1: i32) -> (i32, i32) {
    %c0_i32 = arith.constant 0 : i32
    %c0_i32_0 = arith.constant 0 : i32
    %c0_i32_1 = arith.constant 0 : i32
    return %c0_i32, %c0_i32_0 : i32, i32
  }
  func.func @transform_5(%arg0: i32, %arg1: i32) -> (i32, i32) {
    %c0_i32 = arith.constant 0 : i32
    %c0_i32_0 = arith.constant 0 : i32
    return %arg0, %c0_i32 : i32, i32
  }
}

</mosaic_0001>

<bundles_post_ra>
// kernel: tpu_custom_call.1
= control target key start
LH: loop header
LB: loop body
LE: loop exit
PB: predicated region body
PF: predicated region fallthrough
CT: control target
= control target key end

     0   :  { %s2667_s0 = inlined_call_operand.vmem [shape: bf16[16,3,144], index: 0, kind: input, shape index: {}]   ;;  %s2668_s1 = inlined_call_operand.hbm [shape: f32[3,512], index: 1, kind: input, shape index: {}]   ;;  %s2669_s2 = inlined_call_operand.hbm [shape: f32[1,512], index: 2, kind: input, shape index: {}]   ;;  %s2670_s3 = inlined_call_operand.hbm [shape: f32[512,768], index: 3, kind: input, shape index: {}]   ;;  %s2671_s4 = inlined_call_operand.hbm [shape: f32[1,768], index: 4, kind: input, shape index: {}]   ;;  %s2672_s5 = inlined_call_operand.hbm [shape: f32[16,768], index: 5, kind: output, shape index: {}]  }
   0x1   :  { %2678 = sst [smem:[#allocation17_spill]] %s2668_s1 }
   0x2   :  { %2679 = sst [smem:[#allocation18_spill]] %s2669_s2 }
   0x3   :  { %10 = vsyncpa [#allocation4], 0 }
   0x4   :  { %11 = vsyncpa [#allocation7], 0 }
   0x5   :  { %12 = vsyncpa [#allocation10], 0 }
   0x6   :  { %13 = vsyncpa [#allocation5], 0 }
   0x7   :  { %15 = vsyncpa [#allocation5 + $0x1], 0  ;;  %s2367_s18 = smov 0   ;;  %s2369_s19 = smov 0  }
   0x8   :  { %s2371_s20 = smov 0   ;;  %s2373_s21 = smov 0  }
   0x9   :  { %s2375_s22 = smov 0   ;;  %s2377_s23 = smov 0  }
   0xa LB: > { %s1571_s24 = sadd.s32 4294967295, %s2324_s23   ;;  %s1572_s25 = sadd.s32 4294967294, %s2324_s23   ;;  %s2324_s23 = sphi %s2377_s23, %s21_s23   ;;  %s2320_s22 = sphi %s2375_s22, %s2698_s22   ;;  %s2316_s21 = sphi %s2373_s21, %s2697_s21   ;;  %s2312_s20 = sphi %s2371_s20, %s2696_s20   ;;  %s2308_s19 = sphi %s2369_s19, %s2695_s19   ;;  %s2304_s18 = sphi %s2367_s18, %s2694_s18  }
   0xb   : > { %s33_s26 = sadd.s32 1, %s2320_s22  ;;  %s152_s27 = sadd.s32 1, %s2312_s20 }
   0xc   : > { %p35_p0 = scmp.ge.s32.totalorder %s33_s26, 2  ;;  %p162_p1 = scmp.ne.s32.totalorder %s2312_s20, %s2308_s19 }
   0xd   : > { %p163_p2 = scmp.eq.s32.totalorder %s1571_s24, 1  ;;  %p168_p3 = scmp.ne.s32.totalorder %s2308_s19, %s2304_s18 }
   0xe   : > { %s2700_s26 = smov (%p35_p0, %s33_s26), 0  ;;  %p169_p5 = scmp.eq.s32.totalorder %s1572_s25, 1 }
   0xf   : > { %2680 = sst [smem:[#allocation16_spill]] %s2700_s26  ;;  %p2407_p4 = por %p163_p2, %p162_p1 }
  0x10   : > { %s149_s29 = ssub.s32 %s2320_s22, %s2700_s26  ;;  %p1573_p6 = scmp.ge.s32.totalorder %s2324_s23, 1 }
  0x11   : > { %s2681_s28 = scalar_select %p2407_p4, 1, 0 }
  0x12   : > { %p150_p7 = scmp.eq.s32.totalorder %s149_s29, 0  ;;  %p2414_p8 = por %p169_p5, %p168_p3 }
  0x13   : > { %p176_p9 = scmp.lt.s32.totalorder %s2324_s23, 3  ;;  %p2426_p11 = scmp.eq.s32.totalorder %s1571_s24, 0 }
  0x14   : > { %s2682_s30 = scalar_select %p2414_p8, 1, 0 }
  0x15   : > { %s2420_s6 = scalar_select %p150_p7, %s2312_s20, %s152_s27  }
  0x16   : > { %p2422_p10 = pnand %p1573_p6, %p176_p9  ;;  %s2326_s9 = smov [#allocation6]  }
  0x17   : > { %s2684_s8 = scalar_select %p2426_p11, 1, 0 }
  0x18   : > { %s2683_s7 = scalar_select %p2422_p10, 1, 0 }
  0x19   : > { %p2026_p12 = pneg %p2422_p10  ;;  %s200_s10 = sshll.u32 %s2326_s9, 4  ;;  %s201_s10 = int_to_ptr.vmem [resolvable:$true] %s200_s10 }
  0x1a   : > { %s2327_s12 = smov [#allocation3]   ;;  %s2686_s2 = sld [smem:[#allocation18_spill]] }
  0x1b   : > { %p2434_p13 = pnand %p2426_p11, %p2026_p12  ;;  %s189_s13 = sshll.u32 %s2327_s12, 4  ;;  %s2438_s13 = int_to_ptr.vmem [resolvable:$true] %s189_s13 }
  0x1d   : > { %p2448_p1 = pneg %p2434_p13 }
  0x20   : > { %s2122_s16 = scalar_lea.hbm %s2686_s2, 64 }
  0x21   : > { %p2123_p0 = scmp.ne.s32.totalorder %s2686_s2, %s2122_s16  ;;  %p2129_p5 = scmp.lt.u32.totalorder %s2122_s16, %s2686_s2 }
  0x23   : > { %p2125_p2 = pnand %p2448_p1, %p2123_p0 }
  0x25   : > { %p2126_p3 = pneg %p2125_p2 }
  0x27   : > { %p2131_p6 = pnand %p2129_p5, %p2126_p3 }
  0x29   : > { %2134 = shalt.err (!%p2131_p6)
}
  0x2a   : > { %s2135_s9 = scalar_lea.vmem %s201_s10, 64  ;;  %p2143_p8 = scmp.lt.s32.totalorder %s201_s10, %s201_s10 }
  0x2b   : > { %p2136_p7 = scmp.ne.s32.totalorder %s201_s10, %s2135_s9  ;;  %p2144_p4 = scmp.lt.s32.totalorder %s2135_s9, %s2135_s9 }
  0x2d   : > { %p2138_p9 = pnand %p2136_p7, %p2448_p1  ;;  %p2145_p11 = por %p2144_p4, %p2143_p8 }
  0x2f   : > { %p2139_p12 = pneg %p2138_p9 }
  0x31   : > { %p2146_p10 = pnand %p2145_p11, %p2139_p12 }
  0x33   : > { %2149 = shalt.err (!%p2146_p10)
}
  0x34   : > { %2032 = dma.hbm_to_vmem [thread:$0]  (!%p2434_p13), %s2686_s2, 64, %s201_s10, [#allocation7]  }
  0x35   : > { %s2688_s1 = sld [smem:[#allocation17_spill]] }
  0x3b   : > { %s2150_s17 = scalar_lea.hbm %s2688_s1, 256 }
  0x3c   : > { %p2151_p0 = scmp.ne.s32.totalorder %s2688_s1, %s2150_s17  ;;  %p2157_p8 = scmp.lt.u32.totalorder %s2150_s17, %s2688_s1 }
  0x3e   : > { %p2153_p2 = pnand %p2151_p0, %p2448_p1 }
  0x40   : > { %p2154_p4 = pneg %p2153_p2 }
  0x42   : > { %p2159_p10 = pnand %p2157_p8, %p2154_p4 }
  0x44   : > { %2162 = shalt.err (!%p2159_p10)
}
  0x45   : > { %s2163_s10 = scalar_lea.vmem %s2438_s13, 256  ;;  %p2171_p6 = scmp.lt.s32.totalorder %s2438_s13, %s2438_s13 }
  0x46   : > { %p2164_p11 = scmp.ne.s32.totalorder %s2438_s13, %s2163_s10  ;;  %p2172_p7 = scmp.lt.s32.totalorder %s2163_s10, %s2163_s10 }
  0x48   : > { %p2166_p3 = pnand %p2164_p11, %p2448_p1  ;;  %p2173_p9 = por %p2172_p7, %p2171_p6 }
  0x4a   : > { %p2167_p5 = pneg %p2166_p3 }
  0x4c   : > { %p2174_p12 = pnand %p2173_p9, %p2167_p5 }
  0x4e   : > { %2177 = shalt.err (!%p2174_p12)
}
  0x4f   : > { %2029 = dma.hbm_to_vmem [thread:$0]  (!%p2434_p13), %s2688_s1, 256, %s2438_s13, [#allocation4]  }
  0x50   : > { %s2328_s15 = smov [#allocation8]   ;;  %s2178_s27 = scalar_lea.hbm %s2670_s3, 49152 }
  0x51   : > { %s210_s16 = sshll.u32 %s2328_s15, 4  ;;  %p2179_p0 = scmp.ne.s32.totalorder %s2670_s3, %s2178_s27  ;;  %s211_s16 = int_to_ptr.vmem [resolvable:$true] %s210_s16 }
  0x52   : > { %p2185_p8 = scmp.lt.u32.totalorder %s2178_s27, %s2670_s3 }
  0x53   : > { %p2181_p2 = pnand %p2179_p0, %p2448_p1 }
  0x55   : > { %p2182_p4 = pneg %p2181_p2 }
  0x57   : > { %p2187_p10 = pnand %p2185_p8, %p2182_p4 }
  0x59   : > { %2190 = shalt.err (!%p2187_p10)
}
  0x5a   : > { %s2191_s13 = scalar_lea.vmem %s211_s16, 49152  ;;  %p2199_p6 = scmp.lt.s32.totalorder %s211_s16, %s211_s16 }
  0x5b   : > { %p2192_p11 = scmp.ne.s32.totalorder %s211_s16, %s2191_s13  ;;  %p2200_p7 = scmp.lt.s32.totalorder %s2191_s13, %s2191_s13 }
  0x5d   : > { %p2194_p3 = pnand %p2192_p11, %p2448_p1  ;;  %p2201_p9 = por %p2200_p7, %p2199_p6 }
  0x5f   : > { %p2195_p5 = pneg %p2194_p3 }
  0x61   : > { %p2202_p12 = pnand %p2201_p9, %p2195_p5 }
  0x63   : > { %2205 = shalt.err (!%p2202_p12)
}
  0x64   : > { %s2329_s12 = smov 768   ;;  %s2330_s14 = smov 48  }
  0x65   : > { %2035 = dma.hbm_to_vmem [thread:$0]  (!%p2434_p13), %s2670_s3, 49152, %s211_s16, [#allocation7], %s2329_s12, %s2329_s12, %s2330_s14  }
  0x66   : > { %s2331_s17 = smov [#allocation9]   ;;  %s2206_s9 = scalar_lea.hbm %s2671_s4, 96 }
  0x67   : > { %s224_s24 = sshll.u32 %s2331_s17, 4  ;;  %p2207_p0 = scmp.ne.s32.totalorder %s2671_s4, %s2206_s9  ;;  %s225_s24 = int_to_ptr.vmem [resolvable:$true] %s224_s24 }
  0x68   : > { %p2213_p8 = scmp.lt.u32.totalorder %s2206_s9, %s2671_s4 }
  0x69   : > { %p2209_p2 = pnand %p2207_p0, %p2448_p1 }
  0x6b   : > { %p2210_p4 = pneg %p2209_p2 }
  0x6d   : > { %p2215_p10 = pnand %p2213_p8, %p2210_p4 }
  0x6f   : > { %2218 = shalt.err (!%p2215_p10)
}
  0x70   : > { %s2219_s16 = scalar_lea.vmem %s225_s24, 96  ;;  %p2227_p6 = scmp.lt.s32.totalorder %s225_s24, %s225_s24 }
  0x71   : > { %p2220_p11 = scmp.ne.s32.totalorder %s225_s24, %s2219_s16  ;;  %p2228_p7 = scmp.lt.s32.totalorder %s2219_s16, %s2219_s16 }
  0x73   : > { %p2222_p3 = pnand %p2220_p11, %p2448_p1  ;;  %p2229_p9 = por %p2228_p7, %p2227_p6 }
  0x75   : > { %p2223_p5 = pneg %p2222_p3 }
  0x77   : > { %p2230_p12 = pnand %p2229_p9, %p2223_p5 }
  0x79   : > { %2233 = shalt.err (!%p2230_p12)
}
  0x7a   : > { %2038 = dma.hbm_to_vmem [thread:$0]  (!%p2434_p13), %s2671_s4, 96, %s225_s24, [#allocation10]  }
  0x7b   : > { %p2689_p0 = scmp.ne.s32.totalorder %s2683_s7, 0 }
  0x7c   : > { %p2690_p2 = scmp.ne.s32.totalorder (!%p2689_p0), %s2684_s8, 0 }
  0x7d   : > { %252 = sbr.rel (%p2689_p0) target bundleno = 830 (0x33e), region = 40 }
  0x84   : > { %2287 = dma.done.wait (%p2690_p2), [#allocation4], 256  }
  0x85   : > { %2289 = vsyncadd (%p2690_p2), [#allocation4], 4294967040 }
  0x86   : > { %2291 = dma.done.wait (%p2690_p2), [#allocation7], 49216  }
  0x87   : > { %2293 = vsyncadd (%p2690_p2), [#allocation7], 4294918080 }
  0x88   : > { %2295 = dma.done.wait (%p2690_p2), [#allocation10], 96  }
  0x89   : > { %2297 = vsyncadd (%p2690_p2), [#allocation10], 4294967200  ;;  %s1584_s1 = sshll.u32 %s2316_s21, 3  ;;  %vm356_vm0 = vcmask 1042432   ;;  %vm358_vm1 = vcmask 124928   ;;  %vm313_vm2 = vcmask 23552  }
  0x8a   : > { %p299_p13 = scmp.lt.s32.totalorder %s1584_s1, 15  ;;  %v2332_v44 = vmov 0.0   ;;  %v2333_v45 = vmov 1   ;;  %v2334_v46 = vmov 0   ;;  %v595_v47 = vld [vmem:[#allocation8 + $0x8] sm:$0xff]  ;;  %v601_v48 = vld [vmem:[#allocation8 + $0x38] sm:$0xff] }
  0x8b   : > { %314 = vst.msk [vmem:[#allocation2] sm:$0xff] %vm313_vm2, %v2332_v44  ;;  %2111 = vset.pattern.permute.xlu1 %v2333_v45  ;;  %2110 = vset.pattern.permute.xlu0 %v2334_v46  ;;  %v787_v49 = vld [vmem:[#allocation8 + $0x608] sm:$0xff]  ;;  %v1610_v50 = vpack.c.bf16 %v601_v48, %v595_v47  ;;  %v793_v51 = vld [vmem:[#allocation8 + $0x638] sm:$0xff]  ;;  %v594_v52 = vld [vmem:[#allocation8] sm:$0xff]  ;;  %vm440_vm3 = vcmask 1041409   ;;  %vm442_vm4 = vcmask 1042434  }
  0x8c   : > { %s2702_s1 = smov (!%p299_p13, %s1584_s1), 15  ;;  %v600_v53 = vld [vmem:[#allocation8 + $0x30] sm:$0xff]  ;;  %v1674_v54 = vpack.c.bf16 %v793_v51, %v787_v49  ;;  %v786_v56 = vld [vmem:[#allocation8 + $0x600] sm:$0xff]  ;;  %v607_v58 = vld [vmem:[#allocation8 + $0x68] sm:$0xff]  ;;  %vm444_vm5 = vcmask 1043459   ;;  %vm446_vm6 = vcmask 1044484  }
  0x8d   : > { %s1590_s26 = sshll.u32 %s2702_s1, 2  ;;  %v1612_v55 = vpack.c.bf16 %v600_v53, %v594_v52  ;;  %v792_v57 = vld [vmem:[#allocation8 + $0x630] sm:$0xff]  ;;  %1611 = vmatprep.subr.bf16.mxu1 %v1610_v50  ;;  %v613_v60 = vld [vmem:[#allocation8 + $0x98] sm:$0xff]  ;;  %v799_v61 = vld [vmem:[#allocation8 + $0x668] sm:$0xff]  ;;  %vm448_vm7 = vcmask 1045509   ;;  %vm450_vm8 = vcmask 1046534  }
  0x8e   : > { %s306_s25 = scalar_lea.vmem %s2667_s0, %s1590_s26  ;;  %v1676_v59 = vpack.c.bf16 %v792_v57, %v786_v56  ;;  %v805_v62 = vld [vmem:[#allocation8 + $0x698] sm:$0xff]  ;;  %1675 = vmatprep.subr.bf16.mxu0 %v1674_v54  ;;  %v1614_v63 = vpack.c.bf16 %v613_v60, %v607_v58  ;;  %v654_v48 = vld [vmem:[#allocation8 + $0x1e0] sm:$0xff]  ;;  %v660_v49 = vld [vmem:[#allocation8 + $0x210] sm:$0xff]  ;;  %vm452_vm9 = vcmask 1047559   ;;  %s294_s8 = sand.u32 1, %s2308_s19  }
  0x8f   : > { %v1592_v0 = vld [vmem:[%s306_s25] sm:$0xff]   ;;  %v1607_v1 = vld [vmem:[%s306_s25 + $0x8] sm:$0xff]   ;;  %v1608_v2 = vld [vmem:[%s306_s25 + $0x10] sm:$0xff]   ;;  %1613 = vmatpush1.bf16.msra.mxu1 %v1612_v55  ;;  %v1632_v57 = vpack.c.bf16 %v660_v49, %v654_v48  ;;  %s2006_s2 = smul.u32 48, %s294_s8  ;;  %p2691_p4 = scmp.ne.s32.totalorder %s2681_s28, 0 }
  0x90   : > { %v1593_v3 = vunpack.c.l.bf16 %v1592_v0  ;;  %v1597_v4 = vunpack.c.l.bf16 %v1607_v1  ;;  %v1594_v5 = vunpack.c.h.bf16 %v1592_v0  ;;  %v1598_v6 = vunpack.c.h.bf16 %v1607_v1  ;;  %v1609_v7 = vld [vmem:[%s306_s25 + $0x18] sm:$0xff]   ;;  %1677 = vmatpush1.bf16.msra.mxu0 %v1676_v59  ;;  %1615 = vmatprep.subr.bf16.mxu1 %v1614_v63  ;;  %v852_v52 = vld [vmem:[#allocation8 + $0x810] sm:$0xff]  ;;  %v667_v53 = vld [vmem:[#allocation8 + $0x248] sm:$0xff]  ;;  %s2007_s17 = smul.u32 768, %s2316_s21  ;;  %s1443_s21 = scalar_lea.sflag [#allocation5], %s294_s8 }
  0x91   : > { %v1601_v8 = vunpack.c.l.bf16 %v1608_v2  ;;  %v1602_v9 = vunpack.c.h.bf16 %v1608_v2  ;;  %v1605_v10 = vunpack.c.l.bf16 %v1609_v7  ;;  %v1606_v18 = vunpack.c.h.bf16 %v1609_v7  ;;  %v606_v1 = vld [vmem:[#allocation8 + $0x60] sm:$0xff]  ;;  %v612_v2 = vld [vmem:[#allocation8 + $0x90] sm:$0xff]  ;;  %v625_v7 = vld [vmem:[#allocation8 + $0xf8] sm:$0xff]  ;;  %s296_s15 = scalar_lea.vmem [#allocation11], %s2006_s2  ;;  %s2336_s13 = smov [#allocation11]  }
  0x92   : > { %v340_v11 = vcombine.high %v1593_v3, %v1593_v3  ;;  %v357_v12 = vsel %vm356_vm0, %v1593_v3, 0.0  ;;  %v342_v13 = vcombine.high %v1597_v4, %v1597_v4  ;;  %v368_v14 = vsel %vm356_vm0, %v1597_v4, 0.0  ;;  %v798_v3 = vld [vmem:[#allocation8 + $0x660] sm:$0xff]  ;;  %v853_v44 = vld [vmem:[#allocation8 + $0x818] sm:$0xff]  ;;  %v859_v55 = vld [vmem:[#allocation8 + $0x848] sm:$0xff]  ;;  %s1457_s24 = sshll.u32 %s296_s15, 4  ;;  %s2618_s9 = scalar_lea.hbm %s2672_s5, %s2007_s17  ;;  %s2620_s24 = int_to_ptr.vmem [resolvable:$true] %s1457_s24 }
  0x93   : > { %v341_v15 = vcombine.high %v1594_v5, %v1594_v5  ;;  %v363_v16 = vsel %vm356_vm0, %v1594_v5, 0.0  ;;  %v343_v17 = vcombine.high %v1598_v6, %v1598_v6  ;;  %v373_v21 = vsel %vm356_vm0, %v1598_v6, 0.0  ;;  %v804_v5 = vld [vmem:[#allocation8 + $0x690] sm:$0xff]  ;;  %v619_v6 = vld [vmem:[#allocation8 + $0xc8] sm:$0xff]  ;;  %v846_v50 = vld [vmem:[#allocation8 + $0x7e0] sm:$0xff]  ;;  %s2234_s10 = scalar_lea.vmem %s2620_s24, 768 }
  0x94   : > { %v359_v19 = vsel %vm358_vm1, %v340_v11, 0.0  ;;  %v369_v20 = vsel %vm358_vm1, %v342_v13, 0.0  ;;  %v344_v22 = vcombine.high %v1601_v8, %v1601_v8  ;;  %v345_v27 = vcombine.high %v1602_v9, %v1602_v9  ;;  %v817_v11 = vld [vmem:[#allocation8 + $0x6f8] sm:$0xff]  ;;  %v666_v60 = vld [vmem:[#allocation8 + $0x240] sm:$0xff]  ;;  %v912_v48 = vld [vmem:[#allocation8 + $0x9f0] sm:$0xff]  ;;  %p2235_p1 = scmp.ne.s32.totalorder %s2620_s24, %s2234_s10  ;;  %s2238_s16 = sshll.u32 %s2336_s13, 4  ;;  %s2239_s16 = int_to_ptr.vmem [resolvable:$false] %s2238_s16 }
  0x95   : > { %v360_v23 = vadd.f32 %v359_v19, %v357_v12  ;;  %v370_v24 = vadd.f32 %v369_v20, %v368_v14  ;;  %v364_v25 = vsel %vm358_vm1, %v341_v15, 0.0  ;;  %v374_v26 = vsel %vm358_vm1, %v343_v17, 0.0  ;;  %v618_v12 = vld [vmem:[#allocation8 + $0xc0] sm:$0xff]  ;;  %v624_v14 = vld [vmem:[#allocation8 + $0xf0] sm:$0xff]  ;;  %v637_v19 = vld [vmem:[#allocation8 + $0x158] sm:$0xff]  ;;  %s2240_s12 = scalar_lea.vmem %s2239_s16, 1536  ;;  %p2241_p11 = scmp.lt.s32.totalorder %s2620_s24, %s2239_s16 }
  0x96   : > { %v365_v28 = vadd.f32 %v364_v25, %v363_v16  ;;  %v375_v29 = vadd.f32 %v374_v26, %v373_v21  ;;  %v378_v30 = vsel %vm356_vm0, %v1601_v8, 0.0  ;;  %v379_v31 = vsel %vm358_vm1, %v344_v22, 0.0  ;;  %v810_v15 = vld [vmem:[#allocation8 + $0x6c0] sm:$0xff]  ;;  %v816_v16 = vld [vmem:[#allocation8 + $0x6f0] sm:$0xff]  ;;  %v823_v20 = vld [vmem:[#allocation8 + $0x728] sm:$0xff]  ;;  %p2236_p8 = pnand %p2235_p1, %p2691_p4  ;;  %p2242_p3 = scmp.lt.s32.totalorder %s2240_s12, %s2234_s10 }
  0x97   : > { %361 = vadd.xlane.f32.xlu0 %v360_v23  ;;  %371 = vadd.xlane.f32.xlu1 %v370_v24  ;;  %v383_v32 = vsel %vm356_vm0, %v1602_v9, 0.0  ;;  %v384_v33 = vsel %vm358_vm1, %v345_v27, 0.0  ;;  %v346_v34 = vcombine.high %v1605_v10, %v1605_v10  ;;  %v347_v35 = vcombine.high %v1606_v18, %v1606_v18  ;;  %v829_v23 = vld [vmem:[#allocation8 + $0x758] sm:$0xff]  ;;  %v630_v24 = vld [vmem:[#allocation8 + $0x120] sm:$0xff]  ;;  %v636_v25 = vld [vmem:[#allocation8 + $0x150] sm:$0xff] }
  0x98   : > { %v380_v36 = vadd.f32 %v379_v31, %v378_v30  ;;  %v385_v37 = vadd.f32 %v384_v33, %v383_v32  ;;  %v388_v38 = vsel %vm356_vm0, %v1605_v10, 0.0  ;;  %v393_v40 = vsel %vm356_vm0, %v1606_v18, 0.0  ;;  %v811_v10 = vld [vmem:[#allocation8 + $0x6c8] sm:$0xff]  ;;  %v822_v27 = vld [vmem:[#allocation8 + $0x720] sm:$0xff]  ;;  %v649_v30 = vld [vmem:[#allocation8 + $0x1b8] sm:$0xff]  ;;  %p2237_p10 = pneg %p2236_p8  ;;  %p2243_p5 = por %p2242_p3, %p2241_p11 }
  0x99   : > { %v389_v39 = vsel %vm358_vm1, %v346_v34, 0.0  ;;  %v394_v41 = vsel %vm358_vm1, %v347_v35, 0.0  ;;  %v1678_v0 = vpack.c.bf16 %v805_v62, %v799_v61  ;;  %v1616_v4 = vpack.c.bf16 %v612_v2, %v606_v1  ;;  %v631_v18 = vld [vmem:[#allocation8 + $0x128] sm:$0xff]  ;;  %v841_v32 = vld [vmem:[#allocation8 + $0x7b8] sm:$0xff]  ;;  %v672_v61 = vld [vmem:[#allocation8 + $0x270] sm:$0xff] }
  0x9a   : > { %v390_v42 = vadd.f32 %v389_v39, %v388_v38  ;;  %v395_v43 = vadd.f32 %v394_v41, %v393_v40  ;;  %v1680_v8 = vpack.c.bf16 %v804_v5, %v798_v3  ;;  %v1618_v9 = vpack.c.bf16 %v625_v7, %v619_v6  ;;  %v835_v31 = vld [vmem:[#allocation8 + $0x788] sm:$0xff]  ;;  %v834_v38 = vld [vmem:[#allocation8 + $0x780] sm:$0xff]  ;;  %v840_v40 = vld [vmem:[#allocation8 + $0x7b0] sm:$0xff]  ;;  %p2244_p6 = pnand %p2243_p5, %p2237_p10 }
  0x9b   : > { %366 = vadd.xlane.f32.xlu0 %v365_v28  ;;  %376 = vadd.xlane.f32.xlu1 %v375_v29  ;;  %v1682_v13 = vpack.c.bf16 %v817_v11, %v811_v10  ;;  %v1620_v17 = vpack.c.bf16 %v624_v14, %v618_v12  ;;  %v1684_v21 = vpack.c.bf16 %v816_v16, %v810_v15  ;;  %v828_v28 = vld [vmem:[#allocation8 + $0x750] sm:$0xff]  ;;  %v643_v29 = vld [vmem:[#allocation8 + $0x188] sm:$0xff]  ;;  %v673_v54 = vld [vmem:[#allocation8 + $0x278] sm:$0xff] }
  0x9c   : > { %1679 = vmatprep.subr.bf16.mxu0 %v1678_v0  ;;  %1617 = vmatpush1.bf16.msra.mxu1 %v1616_v4  ;;  %v1622_v22 = vpack.c.bf16 %v637_v19, %v631_v18  ;;  %v1686_v26 = vpack.c.bf16 %v829_v23, %v823_v20  ;;  %v1624_v33 = vpack.c.bf16 %v636_v25, %v630_v24  ;;  %v655_v41 = vld [vmem:[#allocation8 + $0x1e8] sm:$0xff]  ;;  %v865_v56 = vld [vmem:[#allocation8 + $0x878] sm:$0xff]  ;;  %v858_v62 = vld [vmem:[#allocation8 + $0x840] sm:$0xff] }
  0x9d   : > { %1681 = vmatpush1.bf16.msra.mxu0 %v1680_v8  ;;  %1619 = vmatprep.subr.bf16.mxu1 %v1618_v9  ;;  %v1688_v34 = vpack.c.bf16 %v828_v28, %v822_v27  ;;  %v1626_v35 = vpack.c.bf16 %v649_v30, %v643_v29  ;;  %v1690_v39 = vpack.c.bf16 %v841_v32, %v835_v31  ;;  %v864_v0 = vld [vmem:[#allocation8 + $0x870] sm:$0xff]  ;;  %v679_v1 = vld [vmem:[#allocation8 + $0x2a8] sm:$0xff]  ;;  %v685_v2 = vld [vmem:[#allocation8 + $0x2d8] sm:$0xff] }
  0x9e   : > { %1683 = vmatprep.subr.bf16.mxu0 %v1682_v13  ;;  %v1692_v46 = vpack.c.bf16 %v840_v40, %v834_v38  ;;  %v1696_v58 = vpack.c.bf16 %v852_v52, %v846_v50  ;;  %v1634_v59 = vpack.c.bf16 %v673_v54, %v667_v53  ;;  %v1698_v63 = vpack.c.bf16 %v865_v56, %v859_v55  ;;  %v871_v3 = vld [vmem:[#allocation8 + $0x8a8] sm:$0xff]  ;;  %v877_v4 = vld [vmem:[#allocation8 + $0x8d8] sm:$0xff]  ;;  %v678_v8 = vld [vmem:[#allocation8 + $0x2a0] sm:$0xff] }
  0x9f   : > { %381 = vadd.xlane.f32.xlu0 %v380_v36  ;;  %386 = vadd.xlane.f32.xlu1 %v385_v37  ;;  %v642_v36 = vld [vmem:[#allocation8 + $0x180] sm:$0xff]  ;;  %v648_v37 = vld [vmem:[#allocation8 + $0x1b0] sm:$0xff]  ;;  %v1636_v5 = vpack.c.bf16 %v672_v61, %v666_v60  ;;  %v1700_v6 = vpack.c.bf16 %v864_v0, %v858_v62  ;;  %v1638_v7 = vpack.c.bf16 %v685_v2, %v679_v1  ;;  %v691_v13 = vld [vmem:[#allocation8 + $0x308] sm:$0xff] }
  0xa0   : > { %1621 = vmatpush1.bf16.msra.mxu1 %v1620_v17  ;;  %v1628_v45 = vpack.c.bf16 %v648_v37, %v642_v36  ;;  %v684_v9 = vld [vmem:[#allocation8 + $0x2d0] sm:$0xff]  ;;  %v870_v10 = vld [vmem:[#allocation8 + $0x8a0] sm:$0xff]  ;;  %v1702_v11 = vpack.c.bf16 %v877_v4, %v871_v3  ;;  %v697_v14 = vld [vmem:[#allocation8 + $0x338] sm:$0xff] }
  0xa1   : > { %1685 = vmatpush1.bf16.msra.mxu0 %v1684_v21  ;;  %1623 = vmatprep.subr.bf16.mxu1 %v1622_v22  ;;  %v876_v12 = vld [vmem:[#allocation8 + $0x8d0] sm:$0xff]  ;;  %v883_v15 = vld [vmem:[#allocation8 + $0x908] sm:$0xff]  ;;  %v889_v16 = vld [vmem:[#allocation8 + $0x938] sm:$0xff]  ;;  %v1640_v17 = vpack.c.bf16 %v684_v9, %v678_v8  ;;  %v1642_v19 = vpack.c.bf16 %v697_v14, %v691_v13 }
  0xa2   : > { %1687 = vmatprep.subr.bf16.mxu0 %v1686_v26  ;;  %v1704_v18 = vpack.c.bf16 %v876_v12, %v870_v10  ;;  %v690_v20 = vld [vmem:[#allocation8 + $0x300] sm:$0xff]  ;;  %v696_v21 = vld [vmem:[#allocation8 + $0x330] sm:$0xff]  ;;  %v1706_v23 = vpack.c.bf16 %v889_v16, %v883_v15  ;;  %v703_v25 = vld [vmem:[#allocation8 + $0x368] sm:$0xff] }
  0xa3   : > { %391 = vadd.xlane.f32.xlu0 %v390_v42  ;;  %396 = vadd.xlane.f32.xlu1 %v395_v43  ;;  %v661_v42 = vld [vmem:[#allocation8 + $0x218] sm:$0xff]  ;;  %v847_v43 = vld [vmem:[#allocation8 + $0x7e8] sm:$0xff]  ;;  %v882_v22 = vld [vmem:[#allocation8 + $0x900] sm:$0xff]  ;;  %v1644_v29 = vpack.c.bf16 %v696_v21, %v690_v20 }
  0xa4   : > { %1625 = vmatpush1.bf16.msra.mxu1 %v1624_v33  ;;  %v1630_v47 = vpack.c.bf16 %v661_v42, %v655_v41  ;;  %v1694_v51 = vpack.c.bf16 %v853_v44, %v847_v43  ;;  %v888_v24 = vld [vmem:[#allocation8 + $0x930] sm:$0xff]  ;;  %v709_v26 = vld [vmem:[#allocation8 + $0x398] sm:$0xff]  ;;  %v895_v27 = vld [vmem:[#allocation8 + $0x968] sm:$0xff] }
  0xa5   : > { %1689 = vmatpush1.bf16.msra.mxu0 %v1688_v34  ;;  %1627 = vmatprep.subr.bf16.mxu1 %v1626_v35  ;;  %v901_v28 = vld [vmem:[#allocation8 + $0x998] sm:$0xff]  ;;  %v1708_v30 = vpack.c.bf16 %v888_v24, %v882_v22  ;;  %v1646_v31 = vpack.c.bf16 %v709_v26, %v703_v25  ;;  %v702_v32 = vld [vmem:[#allocation8 + $0x360] sm:$0xff]  ;;  %v708_v33 = vld [vmem:[#allocation8 + $0x390] sm:$0xff] }
  0xa6   : > { %1691 = vmatprep.subr.bf16.mxu0 %v1690_v39  ;;  %v894_v34 = vld [vmem:[#allocation8 + $0x960] sm:$0xff]  ;;  %v1710_v35 = vpack.c.bf16 %v901_v28, %v895_v27  ;;  %v900_v36 = vld [vmem:[#allocation8 + $0x990] sm:$0xff]  ;;  %v715_v37 = vld [vmem:[#allocation8 + $0x3c8] sm:$0xff]  ;;  %v1648_v41 = vpack.c.bf16 %v708_v33, %v702_v32 }
  0xa7   : > { %v721_v38 = vld [vmem:[#allocation8 + $0x3f8] sm:$0xff]  ;;  %v907_v39 = vld [vmem:[#allocation8 + $0x9c8] sm:$0xff]  ;;  %v1712_v42 = vpack.c.bf16 %v900_v36, %v894_v34  ;;  %v714_v44 = vld [vmem:[#allocation8 + $0x3c0] sm:$0xff] }
  0xa8   : > { %1629 = vmatpush1.bf16.msra.mxu1 %v1628_v45  ;;  %v913_v40 = vld [vmem:[#allocation8 + $0x9f8] sm:$0xff]  ;;  %v1650_v43 = vpack.c.bf16 %v721_v38, %v715_v37  ;;  %v720_v45 = vld [vmem:[#allocation8 + $0x3f0] sm:$0xff]  ;;  %v331_v12 = vld [vmem:[#allocation2] sm:$0xff] }
  0xa9   : > { %1693 = vmatpush1.bf16.msra.mxu0 %v1692_v46  ;;  %1631 = vmatprep.subr.bf16.mxu1 %v1630_v47  ;;  %v1714_v46 = vpack.c.bf16 %v913_v40, %v907_v39  ;;  %v906_v47 = vld [vmem:[#allocation8 + $0x9c0] sm:$0xff]  ;;  %v1652_v49 = vpack.c.bf16 %v720_v45, %v714_v44  ;;  %v919_v20 = vld [vmem:[#allocation8 + $0xa28] sm:$0xff]  ;;  %v925_v22 = vld [vmem:[#allocation8 + $0xa58] sm:$0xff] }
  0xaa   : > { %1695 = vmatprep.subr.bf16.mxu0 %v1694_v51  ;;  %v1716_v50 = vpack.c.bf16 %v912_v48, %v906_v47  ;;  %v406_v51 = vlaneseq  ;;  %v732_v24 = vld [vmem:[#allocation8 + $0x450] sm:$0xff]  ;;  %v918_v25 = vld [vmem:[#allocation8 + $0xa20] sm:$0xff]  ;;  %v1718_v27 = vpack.c.bf16 %v925_v22, %v919_v20  ;;  %v931_v32 = vld [vmem:[#allocation8 + $0xa88] sm:$0xff] }
  0xab   : > { %v924_v26 = vld [vmem:[#allocation8 + $0xa50] sm:$0xff]  ;;  %v937_v34 = vld [vmem:[#allocation8 + $0xab8] sm:$0xff]  ;;  %v738_v37 = vld [vmem:[#allocation8 + $0x480] sm:$0xff] }
  0xac   : > { %1633 = vmatpush1.bf16.msra.mxu1 %v1632_v57  ;;  %v407_v52 = vand.u32 127, %v406_v51  ;;  %v2558_v53 = vshrl.u32 %v406_v51, 7  ;;  %v1722_v36 = vpack.c.bf16 %v937_v34, %v931_v32  ;;  %v744_v38 = vld [vmem:[#allocation8 + $0x4b0] sm:$0xff]  ;;  %v930_v39 = vld [vmem:[#allocation8 + $0xa80] sm:$0xff]  ;;  %v757_v44 = vld [vmem:[#allocation8 + $0x518] sm:$0xff] }
  0xad   : > { %1697 = vmatpush1.bf16.msra.mxu0 %v1696_v58  ;;  %1635 = vmatprep.subr.bf16.mxu1 %v1634_v59  ;;  %v1660_v40 = vpack.c.bf16 %v744_v38, %v738_v37  ;;  %v943_v45 = vld [vmem:[#allocation8 + $0xae8] sm:$0xff]  ;;  %v949_v47 = vld [vmem:[#allocation8 + $0xb18] sm:$0xff]  ;;  %v750_v48 = vld [vmem:[#allocation8 + $0x4e0] sm:$0xff] }
  0xae   : > { %1699 = vmatprep.subr.bf16.mxu0 %v1698_v63  ;;  %v410_v56 = vsub.s32 %v407_v52, %v2558_v53  ;;  %v942_v52 = vld [vmem:[#allocation8 + $0xae0] sm:$0xff]  ;;  %v605_v20 = vld [vmem:[#allocation8 + $0x58] sm:$0xff]  ;;  %v2563_v22 = vsub.s32 0, %v2558_v53 }
  0xb0   : > { %1637 = vmatpush1.bf16.msra.mxu1 %v1636_v5 }
  0xb1   : > { %1701 = vmatpush1.bf16.msra.mxu0 %v1700_v6  ;;  %1639 = vmatprep.subr.bf16.mxu1 %v1638_v7 }
  0xb2   : > { %1703 = vmatprep.subr.bf16.mxu0 %v1702_v11 }
  0xb4   : > { %1641 = vmatpush1.bf16.msra.mxu1 %v1640_v17 }
  0xb5   : > { %1705 = vmatpush1.bf16.msra.mxu0 %v1704_v18  ;;  %1643 = vmatprep.subr.bf16.mxu1 %v1642_v19  ;;  %v727_v18 = vld [vmem:[#allocation8 + $0x428] sm:$0xff]  ;;  %v733_v19 = vld [vmem:[#allocation8 + $0x458] sm:$0xff] }
  0xb6   : > { %1707 = vmatprep.subr.bf16.mxu0 %v1706_v23  ;;  %v1654_v21 = vpack.c.bf16 %v733_v19, %v727_v18  ;;  %v726_v23 = vld [vmem:[#allocation8 + $0x420] sm:$0xff]  ;;  %v599_v18 = vld [vmem:[#allocation8 + $0x28] sm:$0xff] }
  0xb7   : > { %v1656_v28 = vpack.c.bf16 %v732_v24, %v726_v23  ;;  %v2566_v23 = vsub.s32 1, %v2558_v53  ;;  %v2569_v24 = vsub.s32 2, %v2558_v53 }
  0xb8   : > { %1645 = vmatpush1.bf16.msra.mxu1 %v1644_v29  ;;  %v1720_v29 = vpack.c.bf16 %v924_v26, %v918_v25  ;;  %v2572_v25 = vsub.s32 3, %v2558_v53  ;;  %v464_v26 = vld [vmem:[#allocation3] ss:$4 sm:$0xf] }
  0xb9   : > { %1709 = vmatpush1.bf16.msra.mxu0 %v1708_v30  ;;  %1647 = vmatprep.subr.bf16.mxu1 %v1646_v31  ;;  %v739_v30 = vld [vmem:[#allocation8 + $0x488] sm:$0xff]  ;;  %v745_v31 = vld [vmem:[#allocation8 + $0x4b8] sm:$0xff] }
  0xba   : > { %1711 = vmatprep.subr.bf16.mxu0 %v1710_v35  ;;  %v1658_v33 = vpack.c.bf16 %v745_v31, %v739_v30  ;;  %v2335_v35 = vmov 2   ;;  %v478_v30 = vrot.slane %v464_v26, %v2566_v23  ;;  %v482_v31 = vrot.slane %v464_v26, %v2569_v24 }
  0xbb   : > { %v486_v32 = vrot.slane %v464_v26, %v2572_v25 }
  0xbc   : > { %1649 = vmatpush1.bf16.msra.mxu1 %v1648_v41  ;;  %v936_v41 = vld [vmem:[#allocation8 + $0xab0] sm:$0xff] }
  0xbd   : > { %1713 = vmatpush1.bf16.msra.mxu0 %v1712_v42  ;;  %1651 = vmatprep.subr.bf16.mxu1 %v1650_v43  ;;  %v1724_v42 = vpack.c.bf16 %v936_v41, %v930_v39  ;;  %v751_v43 = vld [vmem:[#allocation8 + $0x4e8] sm:$0xff] }
  0xbe   : > { %1715 = vmatprep.subr.bf16.mxu0 %v1714_v46  ;;  %v1662_v46 = vpack.c.bf16 %v757_v44, %v751_v43 }
  0xc0   : > { %1653 = vmatpush1.bf16.msra.mxu1 %v1652_v49  ;;  %v756_v49 = vld [vmem:[#allocation8 + $0x510] sm:$0xff] }
  0xc1   : > { %1717 = vmatpush1.bf16.msra.mxu0 %v1716_v50  ;;  %1655 = vmatprep.subr.bf16.mxu1 %v1654_v21  ;;  %v1726_v50 = vpack.c.bf16 %v949_v47, %v943_v45  ;;  %v1664_v51 = vpack.c.bf16 %v756_v49, %v750_v48  ;;  %v1866_v21 = vpack.c.bf16 %v605_v20, %v599_v18  ;;  %v611_v18 = vld [vmem:[#allocation8 + $0x88] sm:$0xff] }
  0xc2   : > { %1719 = vmatprep.subr.bf16.mxu0 %v1718_v27  ;;  %v521_v27 = vld [vmem:[#allocation3 + $0x1] ss:$4 sm:$0xf] }
  0xc3   : > { %v530_v34 = vrot.slane %v521_v27, %v2563_v22  ;;  %v542_v37 = vrot.slane %v521_v27, %v2572_v25 }
  0xc4   : > { %1657 = vmatpush1.bf16.msra.mxu1 %v1656_v28  ;;  %v463_v28 = vld [vmem:[#allocation6] sm:$0xf] }
  0xc5   : > { %1721 = vmatpush1.bf16.msra.mxu0 %v1720_v29  ;;  %1659 = vmatprep.subr.bf16.mxu1 %v1658_v33  ;;  %v474_v29 = vrot.slane %v464_v26, %v2563_v22  ;;  %v556_v33 = vld [vmem:[#allocation3 + $0x2] ss:$4 sm:$0xf]  ;;  %v499_v39 = vrot.slane %v463_v28, %v2563_v22  ;;  %v507_v41 = vrot.slane %v463_v28, %v2569_v24  ;;  %v614_v26 = vld [vmem:[#allocation8 + $0xa0] sm:$0xff] }
  0xc6   : > { %1723 = vmatprep.subr.bf16.mxu0 %v1722_v36  ;;  %v538_v36 = vrot.slane %v521_v27, %v2569_v24  ;;  %v565_v44 = vrot.slane %v556_v33, %v2563_v22  ;;  %v569_v45 = vrot.slane %v556_v33, %v2566_v23  ;;  %v577_v47 = vrot.slane %v556_v33, %v2572_v25 }
  0xc8   : > { %1661 = vmatpush1.bf16.msra.mxu1 %v1660_v40  ;;  %v503_v40 = vrot.slane %v463_v28, %v2566_v23 }
  0xc9   : > { %1725 = vmatpush1.bf16.msra.mxu0 %v1724_v42  ;;  %1663 = vmatprep.subr.bf16.mxu1 %v1662_v46  ;;  %v511_v42 = vrot.slane %v463_v28, %v2572_v25  ;;  %v573_v46 = vrot.slane %v556_v33, %v2569_v24 }
  0xca   : > { %1727 = vmatprep.subr.bf16.mxu0 %v1726_v50 }
  0xcc   : > { %1665 = vmatpush1.bf16.msra.mxu1 %v1664_v51 }
 0x124   : > { %v362_v54 = vpop.xlane.xlu0 %361  ;;  %v372_v55 = vpop.xlane.xlu1 %371 }
 0x125   : > { %v411_v59 = vrot.slane %v362_v54, %v410_v56  ;;  %v419_v62 = vrot.slane %v372_v55, %v410_v56  ;;  %v948_v54 = vld [vmem:[#allocation8 + $0xb10] sm:$0xff] }
 0x126   : > { %v1728_v55 = vpack.c.bf16 %v948_v54, %v942_v52 }
 0x128   : > { %v367_v57 = vpop.xlane.xlu0 %366  ;;  %v377_v58 = vpop.xlane.xlu1 %376  ;;  %1729 = vmatpush1.bf16.msra.mxu0 %v1728_v55 }
 0x129   : > { %v415_v60 = vrot.slane %v367_v57, %v410_v56  ;;  %v423_v61 = vrot.slane %v377_v58, %v410_v56  ;;  %v769_v57 = vld [vmem:[#allocation8 + $0x578] sm:$0xff]  ;;  %v955_v58 = vld [vmem:[#allocation8 + $0xb48] sm:$0xff] }
 0x12b   : > { %v441_v63 = vsel %vm440_vm3, %v415_v60, %v411_v59  ;;  %v961_v60 = vld [vmem:[#allocation8 + $0xb78] sm:$0xff] }
 0x12c   : > { %v443_v0 = vsel %vm442_vm4, %v419_v62, %v441_v63  ;;  %v382_v1 = vpop.xlane.xlu0 %381  ;;  %v387_v2 = vpop.xlane.xlu1 %386  ;;  %v768_v62 = vld [vmem:[#allocation8 + $0x570] sm:$0xff]  ;;  %v1730_v63 = vpack.c.bf16 %v961_v60, %v955_v58 }
 0x12d   : > { %v445_v3 = vsel %vm444_vm5, %v423_v61, %v443_v0  ;;  %v427_v4 = vrot.slane %v382_v1, %v410_v56  ;;  %v431_v5 = vrot.slane %v387_v2, %v410_v56  ;;  %v762_v61 = vld [vmem:[#allocation8 + $0x540] sm:$0xff]  ;;  %v960_v2 = vld [vmem:[#allocation8 + $0xb70] sm:$0xff] }
 0x12e   : > { %v1668_v0 = vpack.c.bf16 %v768_v62, %v762_v61  ;;  %v954_v1 = vld [vmem:[#allocation8 + $0xb40] sm:$0xff]  ;;  %1731 = vmatprep.subr.bf16.mxu0 %v1730_v63 }
 0x12f   : > { %v447_v6 = vsel %vm446_vm6, %v427_v4, %v445_v3  ;;  %v775_v3 = vld [vmem:[#allocation8 + $0x5a8] sm:$0xff]  ;;  %v1732_v4 = vpack.c.bf16 %v960_v2, %v954_v1 }
 0x130   : > { %v392_v7 = vpop.xlane.xlu0 %391  ;;  %v397_v8 = vpop.xlane.xlu1 %396  ;;  %v449_v11 = vsel %vm448_vm7, %v431_v5, %v447_v6  ;;  %v781_v5 = vld [vmem:[#allocation8 + $0x5d8] sm:$0xff]  ;;  %v967_v6 = vld [vmem:[#allocation8 + $0xba8] sm:$0xff] }
 0x131   : > { %v435_v9 = vrot.slane %v392_v7, %v410_v56  ;;  %v439_v10 = vrot.slane %v397_v8, %v410_v56  ;;  %v763_v56 = vld [vmem:[#allocation8 + $0x548] sm:$0xff]  ;;  %v973_v7 = vld [vmem:[#allocation8 + $0xbd8] sm:$0xff]  ;;  %v1670_v8 = vpack.c.bf16 %v781_v5, %v775_v3  ;;  %1733 = vmatpush1.bf16.msra.mxu0 %v1732_v4 }
 0x132   : > { %v1666_v59 = vpack.c.bf16 %v769_v57, %v763_v56 }
 0x133   : > { %v451_v13 = vsel %vm450_vm8, %v435_v9, %v449_v11  ;;  %v1734_v9 = vpack.c.bf16 %v973_v7, %v967_v6  ;;  %v780_v11 = vld [vmem:[#allocation8 + $0x5d0] sm:$0xff] }
 0x134   : > { %v453_v14 = vsel %vm452_vm9, %v439_v10, %v451_v13  ;;  %1667 = vmatprep.subr.bf16.mxu1 %v1666_v59  ;;  %v774_v10 = vld [vmem:[#allocation8 + $0x5a0] sm:$0xff] }
 0x135   : > { %v455_v15 = vadd.f32 %v453_v14, %v331_v12  ;;  %1669 = vmatpush1.bf16.msra.mxu1 %v1668_v0  ;;  %v966_v12 = vld [vmem:[#allocation8 + $0xba0] sm:$0xff]  ;;  %v1672_v13 = vpack.c.bf16 %v780_v11, %v774_v10  ;;  %v972_v14 = vld [vmem:[#allocation8 + $0xbd0] sm:$0xff]  ;;  %1735 = vmatprep.subr.bf16.mxu0 %v1734_v9 }
 0x136   : > { %1671 = vmatprep.subr.bf16.mxu1 %v1670_v8  ;;  %v596_v10 = vld [vmem:[#allocation8 + $0x10] sm:$0xff]  ;;  %v602_v11 = vld [vmem:[#allocation8 + $0x40] sm:$0xff] }
 0x137   : > { %457 = vst.msk [vmem:[#allocation2] sm:$0xff] %vm313_vm2, %v455_v15  ;;  %v1736_v15 = vpack.c.bf16 %v972_v14, %v966_v12  ;;  %v598_v12 = vld [vmem:[#allocation8 + $0x20] sm:$0xff]  ;;  %v609_v14 = vld [vmem:[#allocation8 + $0x78] sm:$0xff] }
 0x139   : > { %1673 = vmatpush1.bf16.msra.mxu1 %v1672_v13  ;;  %1737 = vmatpush1.bf16.msra.mxu0 %v1736_v15  ;;  %v604_v13 = vld [vmem:[#allocation8 + $0x50] sm:$0xff] }
 0x13a   : > { %1867 = vmatprep.subr.bf16.mxu0 %v1866_v21  ;;  %v608_v21 = vld [vmem:[#allocation8 + $0x70] sm:$0xff]  ;;  %v1868_v28 = vpack.c.bf16 %v604_v13, %v598_v12 }
 0x13b   : > { %v656_v13 = vld [vmem:[#allocation8 + $0x1f0] sm:$0xff] }
 0x13e   : > { %v461_v16 = vld [vmem:[#allocation2] sm:$0xff] }
 0x13f   : > { %v462_v17 = vmul.f32 0.0069444445, %v461_v16  ;;  %v597_v16 = vld [vmem:[#allocation8 + $0x18] sm:$0xff] }
 0x141   : > { %523 = vperm.xlu1 %2111, %v462_v17   ;;  %467 = vperm.xlu0 %2110, %v462_v17  }
 0x145   : > { %2112 = vset.pattern.permute.xlu1 %v2335_v35  ;;  %2113 = vset.pattern.permute.xlu0 %v2335_v35  ;;  %v534_v35 = vrot.slane %v521_v27, %v2566_v23 }
 0x146   : > { %558 = vperm.xlu1 %2112, %v462_v17   ;;  %v603_v17 = vld [vmem:[#allocation8 + $0x48] sm:$0xff] }
 0x147   : > { %v1738_v19 = vpack.c.bf16 %v603_v17, %v597_v16  ;;  %v1740_v16 = vpack.c.bf16 %v602_v11, %v596_v10  ;;  %v615_v17 = vld [vmem:[#allocation8 + $0xa8] sm:$0xff]  ;;  %v665_v11 = vld [vmem:[#allocation8 + $0x238] sm:$0xff] }
 0x148   : > { %v659_v10 = vld [vmem:[#allocation8 + $0x208] sm:$0xff] }
 0x149   : > { %1739 = vmatprep.subr.bf16.mxu1 %v1738_v19  ;;  %v617_v19 = vld [vmem:[#allocation8 + $0xb8] sm:$0xff] }
 0x14a   : > { %v1870_v33 = vpack.c.bf16 %v617_v19, %v611_v18  ;;  %v675_v18 = vld [vmem:[#allocation8 + $0x288] sm:$0xff]  ;;  %v1886_v19 = vpack.c.bf16 %v665_v11, %v659_v10  ;;  %v706_v11 = vld [vmem:[#allocation8 + $0x380] sm:$0xff] }
 0x1c0   : > { %v524_v38 = vpop.permute.xlu1 %523  ;;  %v468_v43 = vpop.permute.xlu0 %467 }
 0x1c1   : > { %v491_v48 = vmul.f32 %v474_v29, %v468_v43  ;;  %v492_v49 = vmul.f32 %v478_v30, %v468_v43  ;;  %v493_v50 = vmul.f32 %v482_v31, %v468_v43  ;;  %v494_v51 = vmul.f32 %v486_v32, %v468_v43  ;;  %v621_v29 = vld [vmem:[#allocation8 + $0xd8] sm:$0xff]  ;;  %v627_v30 = vld [vmem:[#allocation8 + $0x108] sm:$0xff] }
 0x1c2   : > { %v547_v52 = vmul.f32 %v530_v34, %v524_v38  ;;  %v548_v54 = vmul.f32 %v534_v35, %v524_v38  ;;  %v549_v55 = vmul.f32 %v538_v36, %v524_v38  ;;  %v550_v56 = vmul.f32 %v542_v37, %v524_v38  ;;  %v610_v34 = vld [vmem:[#allocation8 + $0x80] sm:$0xff]  ;;  %v616_v35 = vld [vmem:[#allocation8 + $0xb0] sm:$0xff]  ;;  %v623_v37 = vld [vmem:[#allocation8 + $0xe8] sm:$0xff] }
 0x1c3   : > { %v516_v57 = vadd.f32 %v499_v39, %v491_v48  ;;  %v517_v58 = vadd.f32 %v503_v40, %v492_v49  ;;  %v518_v59 = vadd.f32 %v507_v41, %v493_v50  ;;  %v519_v60 = vadd.f32 %v511_v42, %v494_v51  ;;  %v629_v38 = vld [vmem:[#allocation8 + $0x118] sm:$0xff]  ;;  %v620_v40 = vld [vmem:[#allocation8 + $0xd0] sm:$0xff]  ;;  %v626_v41 = vld [vmem:[#allocation8 + $0x100] sm:$0xff] }
 0x1c4   : > { %v1742_v32 = vpack.c.bf16 %v615_v17, %v609_v14  ;;  %v1744_v36 = vpack.c.bf16 %v614_v26, %v608_v21  ;;  %v1746_v39 = vpack.c.bf16 %v627_v30, %v621_v29  ;;  %v1872_v42 = vpack.c.bf16 %v616_v35, %v610_v34  ;;  %v633_v43 = vld [vmem:[#allocation8 + $0x138] sm:$0xff]  ;;  %v635_v49 = vld [vmem:[#allocation8 + $0x148] sm:$0xff]  ;;  %v662_v14 = vld [vmem:[#allocation8 + $0x220] sm:$0xff] }
 0x1c5   : > { %v559_v61 = vpop.permute.xlu1 %558  ;;  %v551_v62 = vadd.f32 %v547_v52, %v516_v57  ;;  %v552_v63 = vadd.f32 %v548_v54, %v517_v58  ;;  %v553_v0 = vadd.f32 %v549_v55, %v518_v59  ;;  %v554_v1 = vadd.f32 %v550_v56, %v519_v60  ;;  %v641_v50 = vld [vmem:[#allocation8 + $0x178] sm:$0xff]  ;;  %v632_v52 = vld [vmem:[#allocation8 + $0x130] sm:$0xff]  ;;  %v638_v54 = vld [vmem:[#allocation8 + $0x160] sm:$0xff] }
 0x1c6   : > { %v582_v2 = vmul.f32 %v565_v44, %v559_v61  ;;  %v583_v3 = vmul.f32 %v569_v45, %v559_v61  ;;  %v584_v4 = vmul.f32 %v573_v46, %v559_v61  ;;  %v585_v5 = vmul.f32 %v577_v47, %v559_v61  ;;  %v639_v44 = vld [vmem:[#allocation8 + $0x168] sm:$0xff]  ;;  %v622_v46 = vld [vmem:[#allocation8 + $0xe0] sm:$0xff]  ;;  %v628_v47 = vld [vmem:[#allocation8 + $0x110] sm:$0xff] }
 0x1c7   : > { %v1874_v45 = vpack.c.bf16 %v629_v38, %v623_v37  ;;  %v1748_v48 = vpack.c.bf16 %v626_v41, %v620_v40  ;;  %v1750_v51 = vpack.c.bf16 %v639_v44, %v633_v43  ;;  %v1876_v55 = vpack.c.bf16 %v628_v47, %v622_v46  ;;  %v645_v56 = vld [vmem:[#allocation8 + $0x198] sm:$0xff]  ;;  %v651_v57 = vld [vmem:[#allocation8 + $0x1c8] sm:$0xff]  ;;  %v634_v59 = vld [vmem:[#allocation8 + $0x140] sm:$0xff] }
 0x1c8   : > { %v586_v6 = vadd.f32 %v582_v2, %v551_v62  ;;  %v587_v7 = vadd.f32 %v583_v3, %v552_v63  ;;  %v588_v8 = vadd.f32 %v584_v4, %v553_v0  ;;  %v589_v9 = vadd.f32 %v585_v5, %v554_v1  ;;  %v640_v60 = vld [vmem:[#allocation8 + $0x170] sm:$0xff]  ;;  %v647_v62 = vld [vmem:[#allocation8 + $0x1a8] sm:$0xff]  ;;  %v653_v63 = vld [vmem:[#allocation8 + $0x1d8] sm:$0xff] }
 0x1c9   : > { %v1878_v58 = vpack.c.bf16 %v641_v50, %v635_v49  ;;  %v1752_v61 = vpack.c.bf16 %v638_v54, %v632_v52  ;;  %v1754_v0 = vpack.c.bf16 %v651_v57, %v645_v56  ;;  %v644_v1 = vld [vmem:[#allocation8 + $0x190] sm:$0xff]  ;;  %v650_v2 = vld [vmem:[#allocation8 + $0x1c0] sm:$0xff]  ;;  %v1880_v3 = vpack.c.bf16 %v640_v60, %v634_v59  ;;  %v657_v4 = vld [vmem:[#allocation8 + $0x1f8] sm:$0xff] }
 0x1ca   : > { %2114 = vtanh.f32 %v586_v6  ;;  %v663_v5 = vld [vmem:[#allocation8 + $0x228] sm:$0xff]  ;;  %v1882_v6 = vpack.c.bf16 %v653_v63, %v647_v62  ;;  %v669_v17 = vld [vmem:[#allocation8 + $0x258] sm:$0xff]  ;;  %v664_v21 = vld [vmem:[#allocation8 + $0x230] sm:$0xff]  ;;  %v1760_v26 = vpack.c.bf16 %v662_v14, %v656_v13 }
 0x1cb   : > { %2116 = vtanh.f32 %v587_v7  ;;  %v646_v7 = vld [vmem:[#allocation8 + $0x1a0] sm:$0xff]  ;;  %v1758_v12 = vpack.c.bf16 %v663_v5, %v657_v4  ;;  %v677_v29 = vld [vmem:[#allocation8 + $0x298] sm:$0xff]  ;;  %v1762_v30 = vpack.c.bf16 %v675_v18, %v669_v17  ;;  %v683_v41 = vld [vmem:[#allocation8 + $0x2c8] sm:$0xff] }
 0x1cc   : > { %2118 = vtanh.f32 %v588_v8  ;;  %v652_v8 = vld [vmem:[#allocation8 + $0x1d0] sm:$0xff]  ;;  %v681_v35 = vld [vmem:[#allocation8 + $0x2b8] sm:$0xff]  ;;  %v670_v38 = vld [vmem:[#allocation8 + $0x260] sm:$0xff] }
 0x1cd   : > { %2120 = vtanh.f32 %v589_v9  ;;  %v1756_v9 = vpack.c.bf16 %v650_v2, %v644_v1  ;;  %v680_v44 = vld [vmem:[#allocation8 + $0x2b0] sm:$0xff]  ;;  %v693_v47 = vld [vmem:[#allocation8 + $0x318] sm:$0xff]  ;;  %v682_v50 = vld [vmem:[#allocation8 + $0x2c0] sm:$0xff] }
 0x1ce   : > { %v695_v54 = vld [vmem:[#allocation8 + $0x328] sm:$0xff]  ;;  %v692_v57 = vld [vmem:[#allocation8 + $0x310] sm:$0xff]  ;;  %v705_v60 = vld [vmem:[#allocation8 + $0x378] sm:$0xff] }
 0x1cf   : > { %v694_v63 = vld [vmem:[#allocation8 + $0x320] sm:$0xff]  ;;  %v707_v2 = vld [vmem:[#allocation8 + $0x388] sm:$0xff]  ;;  %v704_v5 = vld [vmem:[#allocation8 + $0x370] sm:$0xff] }
 0x1d0   : > { %v719_v14 = vld [vmem:[#allocation8 + $0x3e8] sm:$0xff]  ;;  %v716_v18 = vld [vmem:[#allocation8 + $0x3d0] sm:$0xff] }
 0x1d4   : > { %v2590_v15 = vpop.eup %2114 }
 0x1d5   : > { %v2117_v20 = vpop.eup %2116 }
 0x1d6   : > { %v2592_v27 = vpop.eup %2118  ;;  %1074 = vmatprep.mubr.f32.mxu1 %v2117_v20 }
 0x1d7   : > { %v2594_v31 = vpop.eup %2120  ;;  %1075 = vmatmul.mubr.f32.vlgmr.msra.gmra.mrb[0].mxu1 %v2590_v15 }
 0x1d8   : > { %1145 = vmatprep.mubr.f32.mxu0 %v2594_v31  ;;  %1741 = vmatpush1.bf16.msra.mxu1 %v1740_v16  ;;  %v1884_v16 = vpack.c.bf16 %v652_v8, %v646_v7  ;;  %v717_v8 = vld [vmem:[#allocation8 + $0x3d8] sm:$0xff] }
 0x1d9   : > { %1146 = vmatmul.mubr.f32.vlgmr.msra.gmra.mrb[0].mxu0 %v2592_v27  ;;  %1216 = vmatprep.mubr.f32.mxu1 %v2117_v20 }
 0x1da   : > { %1869 = vmatpush1.bf16.msra.mxu0 %v1868_v28  ;;  %1358 = vmatprep.mubr.f32.mxu0 %v2117_v20  ;;  %v658_v20 = vld [vmem:[#allocation8 + $0x200] sm:$0xff]  ;;  %v671_v28 = vld [vmem:[#allocation8 + $0x268] sm:$0xff] }
 0x1db   : > { %1743 = vmatprep.subr.bf16.mxu1 %v1742_v32  ;;  %1871 = vmatprep.subr.bf16.mxu0 %v1870_v33  ;;  %v668_v32 = vld [vmem:[#allocation8 + $0x250] sm:$0xff]  ;;  %v674_v33 = vld [vmem:[#allocation8 + $0x280] sm:$0xff]  ;;  %v1888_v34 = vpack.c.bf16 %v664_v21, %v658_v20  ;;  %v1890_v37 = vpack.c.bf16 %v677_v29, %v671_v28  ;;  %v729_v21 = vld [vmem:[#allocation8 + $0x438] sm:$0xff] }
 0x1dc   : > { %1745 = vmatpush1.bf16.msra.mxu1 %v1744_v36  ;;  %v687_v36 = vld [vmem:[#allocation8 + $0x2e8] sm:$0xff]  ;;  %v1764_v40 = vpack.c.bf16 %v674_v33, %v668_v32  ;;  %v718_v29 = vld [vmem:[#allocation8 + $0x3e0] sm:$0xff] }
 0x1dd   : > { %1747 = vmatprep.subr.bf16.mxu1 %v1746_v39  ;;  %v676_v39 = vld [vmem:[#allocation8 + $0x290] sm:$0xff]  ;;  %v1766_v43 = vpack.c.bf16 %v687_v36, %v681_v35  ;;  %v731_v33 = vld [vmem:[#allocation8 + $0x448] sm:$0xff] }
 0x1de   : > { %1873 = vmatpush1.bf16.msra.mxu0 %v1872_v42  ;;  %v689_v42 = vld [vmem:[#allocation8 + $0x2f8] sm:$0xff]  ;;  %v1892_v46 = vpack.c.bf16 %v676_v39, %v670_v38  ;;  %v728_v36 = vld [vmem:[#allocation8 + $0x430] sm:$0xff] }
 0x1df   : > { %1875 = vmatprep.subr.bf16.mxu0 %v1874_v45  ;;  %v686_v45 = vld [vmem:[#allocation8 + $0x2e0] sm:$0xff]  ;;  %v1894_v49 = vpack.c.bf16 %v689_v42, %v683_v41  ;;  %v741_v39 = vld [vmem:[#allocation8 + $0x498] sm:$0xff] }
 0x1e0   : > { %1749 = vmatpush1.bf16.msra.mxu1 %v1748_v48  ;;  %v699_v48 = vld [vmem:[#allocation8 + $0x348] sm:$0xff]  ;;  %v1768_v52 = vpack.c.bf16 %v686_v45, %v680_v44  ;;  %v730_v42 = vld [vmem:[#allocation8 + $0x440] sm:$0xff] }
 0x1e1   : > { %1751 = vmatprep.subr.bf16.mxu1 %v1750_v51  ;;  %v688_v51 = vld [vmem:[#allocation8 + $0x2f0] sm:$0xff]  ;;  %v1770_v56 = vpack.c.bf16 %v699_v48, %v693_v47  ;;  %v743_v45 = vld [vmem:[#allocation8 + $0x4a8] sm:$0xff] }
 0x1e2   : > { %1877 = vmatpush1.bf16.msra.mxu0 %v1876_v55  ;;  %v701_v55 = vld [vmem:[#allocation8 + $0x358] sm:$0xff]  ;;  %v1896_v59 = vpack.c.bf16 %v688_v51, %v682_v50  ;;  %v740_v48 = vld [vmem:[#allocation8 + $0x490] sm:$0xff] }
 0x1e3   : > { %1879 = vmatprep.subr.bf16.mxu0 %v1878_v58  ;;  %v698_v58 = vld [vmem:[#allocation8 + $0x340] sm:$0xff]  ;;  %v1898_v62 = vpack.c.bf16 %v701_v55, %v695_v54  ;;  %v753_v51 = vld [vmem:[#allocation8 + $0x4f8] sm:$0xff] }
 0x1e4   : > { %1753 = vmatpush1.bf16.msra.mxu1 %v1752_v61  ;;  %v711_v61 = vld [vmem:[#allocation8 + $0x3a8] sm:$0xff]  ;;  %v1772_v1 = vpack.c.bf16 %v698_v58, %v692_v57  ;;  %v742_v55 = vld [vmem:[#allocation8 + $0x4a0] sm:$0xff] }
 0x1e5   : > { %1755 = vmatprep.subr.bf16.mxu1 %v1754_v0  ;;  %v700_v0 = vld [vmem:[#allocation8 + $0x350] sm:$0xff]  ;;  %v1774_v4 = vpack.c.bf16 %v711_v61, %v705_v60  ;;  %v755_v58 = vld [vmem:[#allocation8 + $0x508] sm:$0xff] }
 0x1e6   : > { %1881 = vmatpush1.bf16.msra.mxu0 %v1880_v3  ;;  %v713_v3 = vld [vmem:[#allocation8 + $0x3b8] sm:$0xff]  ;;  %v1900_v7 = vpack.c.bf16 %v700_v0, %v694_v63  ;;  %v752_v61 = vld [vmem:[#allocation8 + $0x4f0] sm:$0xff] }
 0x1e7   : > { %1883 = vmatprep.subr.bf16.mxu0 %v1882_v6  ;;  %v710_v6 = vld [vmem:[#allocation8 + $0x3a0] sm:$0xff]  ;;  %v1902_v10 = vpack.c.bf16 %v713_v3, %v707_v2  ;;  %v765_v0 = vld [vmem:[#allocation8 + $0x558] sm:$0xff] }
 0x1e8   : > { %1757 = vmatpush1.bf16.msra.mxu1 %v1756_v9  ;;  %v723_v9 = vld [vmem:[#allocation8 + $0x408] sm:$0xff]  ;;  %v1776_v13 = vpack.c.bf16 %v710_v6, %v704_v5  ;;  %v754_v3 = vld [vmem:[#allocation8 + $0x500] sm:$0xff] }
 0x1e9   : > { %1759 = vmatprep.subr.bf16.mxu1 %v1758_v12  ;;  %v712_v12 = vld [vmem:[#allocation8 + $0x3b0] sm:$0xff]  ;;  %v1778_v17 = vpack.c.bf16 %v723_v9, %v717_v8  ;;  %v767_v6 = vld [vmem:[#allocation8 + $0x568] sm:$0xff] }
 0x1ea   : > { %1885 = vmatpush1.bf16.msra.mxu0 %v1884_v16  ;;  %v725_v16 = vld [vmem:[#allocation8 + $0x418] sm:$0xff]  ;;  %v1904_v20 = vpack.c.bf16 %v712_v12, %v706_v11  ;;  %v764_v9 = vld [vmem:[#allocation8 + $0x550] sm:$0xff] }
 0x1eb   : > { %1887 = vmatprep.subr.bf16.mxu0 %v1886_v19  ;;  %v722_v19 = vld [vmem:[#allocation8 + $0x400] sm:$0xff]  ;;  %v1906_v28 = vpack.c.bf16 %v725_v16, %v719_v14  ;;  %v777_v12 = vld [vmem:[#allocation8 + $0x5b8] sm:$0xff] }
 0x1ec   : > { %1761 = vmatpush1.bf16.msra.mxu1 %v1760_v26  ;;  %v735_v26 = vld [vmem:[#allocation8 + $0x468] sm:$0xff]  ;;  %v1780_v32 = vpack.c.bf16 %v722_v19, %v716_v18  ;;  %v766_v16 = vld [vmem:[#allocation8 + $0x560] sm:$0xff] }
 0x1ed   : > { %1763 = vmatprep.subr.bf16.mxu1 %v1762_v30  ;;  %v724_v30 = vld [vmem:[#allocation8 + $0x410] sm:$0xff]  ;;  %v1782_v35 = vpack.c.bf16 %v735_v26, %v729_v21  ;;  %v779_v19 = vld [vmem:[#allocation8 + $0x5c8] sm:$0xff] }
 0x1ee   : > { %1889 = vmatpush1.bf16.msra.mxu0 %v1888_v34  ;;  %v737_v34 = vld [vmem:[#allocation8 + $0x478] sm:$0xff]  ;;  %v1908_v38 = vpack.c.bf16 %v724_v30, %v718_v29  ;;  %v776_v26 = vld [vmem:[#allocation8 + $0x5b0] sm:$0xff] }
 0x1ef   : > { %1891 = vmatprep.subr.bf16.mxu0 %v1890_v37  ;;  %v734_v37 = vld [vmem:[#allocation8 + $0x460] sm:$0xff]  ;;  %v1910_v41 = vpack.c.bf16 %v737_v34, %v731_v33  ;;  %v789_v30 = vld [vmem:[#allocation8 + $0x618] sm:$0xff] }
 0x1f0   : > { %1765 = vmatpush1.bf16.msra.mxu1 %v1764_v40  ;;  %v747_v40 = vld [vmem:[#allocation8 + $0x4c8] sm:$0xff]  ;;  %v1784_v44 = vpack.c.bf16 %v734_v37, %v728_v36  ;;  %v778_v34 = vld [vmem:[#allocation8 + $0x5c0] sm:$0xff] }
 0x1f1   : > { %1767 = vmatprep.subr.bf16.mxu1 %v1766_v43  ;;  %v736_v43 = vld [vmem:[#allocation8 + $0x470] sm:$0xff]  ;;  %v1786_v47 = vpack.c.bf16 %v747_v40, %v741_v39  ;;  %v791_v37 = vld [vmem:[#allocation8 + $0x628] sm:$0xff] }
 0x1f2   : > { %1893 = vmatpush1.bf16.msra.mxu0 %v1892_v46  ;;  %v749_v46 = vld [vmem:[#allocation8 + $0x4d8] sm:$0xff]  ;;  %v1912_v50 = vpack.c.bf16 %v736_v43, %v730_v42  ;;  %v788_v40 = vld [vmem:[#allocation8 + $0x610] sm:$0xff] }
 0x1f3   : > { %1895 = vmatprep.subr.bf16.mxu0 %v1894_v49  ;;  %v746_v49 = vld [vmem:[#allocation8 + $0x4c0] sm:$0xff]  ;;  %v1914_v54 = vpack.c.bf16 %v749_v46, %v743_v45  ;;  %v801_v43 = vld [vmem:[#allocation8 + $0x678] sm:$0xff] }
 0x1f4   : > { %1769 = vmatpush1.bf16.msra.mxu1 %v1768_v52  ;;  %v759_v52 = vld [vmem:[#allocation8 + $0x528] sm:$0xff]  ;;  %v1788_v57 = vpack.c.bf16 %v746_v49, %v740_v48  ;;  %v790_v46 = vld [vmem:[#allocation8 + $0x620] sm:$0xff] }
 0x1f5   : > { %1771 = vmatprep.subr.bf16.mxu1 %v1770_v56  ;;  %v748_v56 = vld [vmem:[#allocation8 + $0x4d0] sm:$0xff]  ;;  %v1790_v60 = vpack.c.bf16 %v759_v52, %v753_v51  ;;  %v803_v49 = vld [vmem:[#allocation8 + $0x688] sm:$0xff] }
 0x1f6   : > { %1897 = vmatpush1.bf16.msra.mxu0 %v1896_v59  ;;  %v761_v59 = vld [vmem:[#allocation8 + $0x538] sm:$0xff]  ;;  %v1916_v63 = vpack.c.bf16 %v748_v56, %v742_v55  ;;  %v800_v52 = vld [vmem:[#allocation8 + $0x670] sm:$0xff] }
 0x1f7   : > { %1899 = vmatprep.subr.bf16.mxu0 %v1898_v62  ;;  %v758_v62 = vld [vmem:[#allocation8 + $0x520] sm:$0xff]  ;;  %v1918_v2 = vpack.c.bf16 %v761_v59, %v755_v58  ;;  %v813_v56 = vld [vmem:[#allocation8 + $0x6d8] sm:$0xff] }
 0x1f8   : > { %1773 = vmatpush1.bf16.msra.mxu1 %v1772_v1  ;;  %v771_v1 = vld [vmem:[#allocation8 + $0x588] sm:$0xff]  ;;  %v1792_v5 = vpack.c.bf16 %v758_v62, %v752_v61  ;;  %v802_v59 = vld [vmem:[#allocation8 + $0x680] sm:$0xff] }
 0x1f9   : > { %1775 = vmatprep.subr.bf16.mxu1 %v1774_v4  ;;  %v760_v4 = vld [vmem:[#allocation8 + $0x530] sm:$0xff]  ;;  %v1794_v8 = vpack.c.bf16 %v771_v1, %v765_v0  ;;  %v815_v62 = vld [vmem:[#allocation8 + $0x6e8] sm:$0xff] }
 0x1fa   : > { %1901 = vmatpush1.bf16.msra.mxu0 %v1900_v7  ;;  %v773_v7 = vld [vmem:[#allocation8 + $0x598] sm:$0xff]  ;;  %v1920_v11 = vpack.c.bf16 %v760_v4, %v754_v3  ;;  %v812_v1 = vld [vmem:[#allocation8 + $0x6d0] sm:$0xff] }
 0x1fb   : > { %1903 = vmatprep.subr.bf16.mxu0 %v1902_v10  ;;  %v770_v10 = vld [vmem:[#allocation8 + $0x580] sm:$0xff]  ;;  %v1922_v14 = vpack.c.bf16 %v773_v7, %v767_v6  ;;  %v825_v4 = vld [vmem:[#allocation8 + $0x738] sm:$0xff] }
 0x1fc   : > { %1777 = vmatpush1.bf16.msra.mxu1 %v1776_v13  ;;  %v783_v13 = vld [vmem:[#allocation8 + $0x5e8] sm:$0xff]  ;;  %v1796_v18 = vpack.c.bf16 %v770_v10, %v764_v9  ;;  %v814_v7 = vld [vmem:[#allocation8 + $0x6e0] sm:$0xff] }
 0x1fd   : > { %1779 = vmatprep.subr.bf16.mxu1 %v1778_v17  ;;  %v772_v17 = vld [vmem:[#allocation8 + $0x590] sm:$0xff]  ;;  %v1798_v21 = vpack.c.bf16 %v783_v13, %v777_v12  ;;  %v827_v10 = vld [vmem:[#allocation8 + $0x748] sm:$0xff]  ;;  %v830_v13 = vld [vmem:[#allocation8 + $0x760] sm:$0xff] }
 0x1fe   : > { %1905 = vmatpush1.bf16.msra.mxu0 %v1904_v20  ;;  %v785_v20 = vld [vmem:[#allocation8 + $0x5f8] sm:$0xff]  ;;  %v1924_v29 = vpack.c.bf16 %v772_v17, %v766_v16  ;;  %v824_v12 = vld [vmem:[#allocation8 + $0x730] sm:$0xff]  ;;  %v843_v17 = vld [vmem:[#allocation8 + $0x7c8] sm:$0xff] }
 0x1ff   : > { %1907 = vmatprep.subr.bf16.mxu0 %v1906_v28  ;;  %v782_v28 = vld [vmem:[#allocation8 + $0x5e0] sm:$0xff]  ;;  %v1926_v33 = vpack.c.bf16 %v785_v20, %v779_v19  ;;  %v837_v16 = vld [vmem:[#allocation8 + $0x798] sm:$0xff]  ;;  %v832_v19 = vld [vmem:[#allocation8 + $0x770] sm:$0xff]  ;;  %v1816_v20 = vpack.c.bf16 %v830_v13, %v824_v12 }
 0x200   : > { %1781 = vmatpush1.bf16.msra.mxu1 %v1780_v32  ;;  %v795_v32 = vld [vmem:[#allocation8 + $0x648] sm:$0xff]  ;;  %v1800_v36 = vpack.c.bf16 %v782_v28, %v776_v26  ;;  %v845_v26 = vld [vmem:[#allocation8 + $0x7d8] sm:$0xff]  ;;  %v1818_v28 = vpack.c.bf16 %v843_v17, %v837_v16  ;;  %v890_v16 = vld [vmem:[#allocation8 + $0x940] sm:$0xff] }
 0x201   : > { %1783 = vmatprep.subr.bf16.mxu1 %v1782_v35  ;;  %v784_v35 = vld [vmem:[#allocation8 + $0x5f0] sm:$0xff]  ;;  %v1802_v39 = vpack.c.bf16 %v795_v32, %v789_v30  ;;  %v842_v30 = vld [vmem:[#allocation8 + $0x7c0] sm:$0xff]  ;;  %v893_v12 = vld [vmem:[#allocation8 + $0x958] sm:$0xff] }
 0x202   : > { %1909 = vmatpush1.bf16.msra.mxu0 %v1908_v38  ;;  %v797_v38 = vld [vmem:[#allocation8 + $0x658] sm:$0xff]  ;;  %v1928_v42 = vpack.c.bf16 %v784_v35, %v778_v34  ;;  %v855_v34 = vld [vmem:[#allocation8 + $0x828] sm:$0xff] }
 0x203   : > { %1911 = vmatprep.subr.bf16.mxu0 %v1910_v41  ;;  %v794_v41 = vld [vmem:[#allocation8 + $0x640] sm:$0xff]  ;;  %v1930_v45 = vpack.c.bf16 %v797_v38, %v791_v37  ;;  %v844_v37 = vld [vmem:[#allocation8 + $0x7d0] sm:$0xff] }
 0x204   : > { %1785 = vmatpush1.bf16.msra.mxu1 %v1784_v44  ;;  %v807_v44 = vld [vmem:[#allocation8 + $0x6a8] sm:$0xff]  ;;  %v1804_v48 = vpack.c.bf16 %v794_v41, %v788_v40  ;;  %v857_v40 = vld [vmem:[#allocation8 + $0x838] sm:$0xff] }
 0x205   : > { %1787 = vmatprep.subr.bf16.mxu1 %v1786_v47  ;;  %v796_v47 = vld [vmem:[#allocation8 + $0x650] sm:$0xff]  ;;  %v1806_v51 = vpack.c.bf16 %v807_v44, %v801_v43  ;;  %v854_v43 = vld [vmem:[#allocation8 + $0x820] sm:$0xff] }
 0x206   : > { %1913 = vmatpush1.bf16.msra.mxu0 %v1912_v50  ;;  %v809_v50 = vld [vmem:[#allocation8 + $0x6b8] sm:$0xff]  ;;  %v1932_v55 = vpack.c.bf16 %v796_v47, %v790_v46  ;;  %v867_v46 = vld [vmem:[#allocation8 + $0x888] sm:$0xff] }
 0x207   : > { %1915 = vmatprep.subr.bf16.mxu0 %v1914_v54  ;;  %v806_v54 = vld [vmem:[#allocation8 + $0x6a0] sm:$0xff]  ;;  %v1934_v58 = vpack.c.bf16 %v809_v50, %v803_v49  ;;  %v856_v49 = vld [vmem:[#allocation8 + $0x830] sm:$0xff] }
 0x208   : > { %1789 = vmatpush1.bf16.msra.mxu1 %v1788_v57  ;;  %v819_v57 = vld [vmem:[#allocation8 + $0x708] sm:$0xff]  ;;  %v1808_v61 = vpack.c.bf16 %v806_v54, %v800_v52  ;;  %v869_v52 = vld [vmem:[#allocation8 + $0x898] sm:$0xff] }
 0x209   : > { %1791 = vmatprep.subr.bf16.mxu1 %v1790_v60  ;;  %v808_v60 = vld [vmem:[#allocation8 + $0x6b0] sm:$0xff]  ;;  %v1810_v0 = vpack.c.bf16 %v819_v57, %v813_v56  ;;  %v866_v56 = vld [vmem:[#allocation8 + $0x880] sm:$0xff] }
 0x20a   : > { %1917 = vmatpush1.bf16.msra.mxu0 %v1916_v63  ;;  %v821_v63 = vld [vmem:[#allocation8 + $0x718] sm:$0xff]  ;;  %v1936_v3 = vpack.c.bf16 %v808_v60, %v802_v59  ;;  %v879_v59 = vld [vmem:[#allocation8 + $0x8e8] sm:$0xff] }
 0x20b   : > { %1919 = vmatprep.subr.bf16.mxu0 %v1918_v2  ;;  %v818_v2 = vld [vmem:[#allocation8 + $0x700] sm:$0xff]  ;;  %v1938_v6 = vpack.c.bf16 %v821_v63, %v815_v62  ;;  %v868_v62 = vld [vmem:[#allocation8 + $0x890] sm:$0xff] }
 0x20c   : > { %1793 = vmatpush1.bf16.msra.mxu1 %v1792_v5  ;;  %v831_v5 = vld [vmem:[#allocation8 + $0x768] sm:$0xff]  ;;  %v1812_v9 = vpack.c.bf16 %v818_v2, %v812_v1  ;;  %v881_v1 = vld [vmem:[#allocation8 + $0x8f8] sm:$0xff] }
 0x20d   : > { %1795 = vmatprep.subr.bf16.mxu1 %v1794_v8  ;;  %v820_v8 = vld [vmem:[#allocation8 + $0x710] sm:$0xff] }
 0x20e   : > { %1921 = vmatpush1.bf16.msra.mxu0 %v1920_v11  ;;  %v833_v11 = vld [vmem:[#allocation8 + $0x778] sm:$0xff] }
 0x20f   : > { %1923 = vmatprep.subr.bf16.mxu0 %v1922_v14  ;;  %v1940_v14 = vpack.c.bf16 %v820_v8, %v814_v7  ;;  %v891_v7 = vld [vmem:[#allocation8 + $0x948] sm:$0xff] }
 0x210   : > { %1797 = vmatpush1.bf16.msra.mxu1 %v1796_v18  ;;  %v826_v18 = vld [vmem:[#allocation8 + $0x740] sm:$0xff] }
 0x211   : > { %1799 = vmatprep.subr.bf16.mxu1 %v1798_v21  ;;  %v839_v21 = vld [vmem:[#allocation8 + $0x7a8] sm:$0xff]  ;;  %v1944_v32 = vpack.c.bf16 %v832_v19, %v826_v18 }
 0x212   : > { %1925 = vmatpush1.bf16.msra.mxu0 %v1924_v29  ;;  %v836_v29 = vld [vmem:[#allocation8 + $0x790] sm:$0xff]  ;;  %v1946_v35 = vpack.c.bf16 %v845_v26, %v839_v21  ;;  %v903_v18 = vld [vmem:[#allocation8 + $0x9a8] sm:$0xff] }
 0x213   : > { %1927 = vmatprep.subr.bf16.mxu0 %v1926_v33  ;;  %v849_v33 = vld [vmem:[#allocation8 + $0x7f8] sm:$0xff]  ;;  %v1820_v38 = vpack.c.bf16 %v842_v30, %v836_v29  ;;  %v892_v21 = vld [vmem:[#allocation8 + $0x950] sm:$0xff] }
 0x214   : > { %1801 = vmatpush1.bf16.msra.mxu1 %v1800_v36  ;;  %v838_v36 = vld [vmem:[#allocation8 + $0x7a0] sm:$0xff]  ;;  %v1822_v41 = vpack.c.bf16 %v855_v34, %v849_v33  ;;  %v905_v29 = vld [vmem:[#allocation8 + $0x9b8] sm:$0xff] }
 0x215   : > { %1803 = vmatprep.subr.bf16.mxu1 %v1802_v39  ;;  %v851_v39 = vld [vmem:[#allocation8 + $0x808] sm:$0xff]  ;;  %v1948_v44 = vpack.c.bf16 %v844_v37, %v838_v36  ;;  %v902_v33 = vld [vmem:[#allocation8 + $0x9a0] sm:$0xff] }
 0x216   : > { %1929 = vmatpush1.bf16.msra.mxu0 %v1928_v42  ;;  %v848_v42 = vld [vmem:[#allocation8 + $0x7f0] sm:$0xff]  ;;  %v1950_v47 = vpack.c.bf16 %v857_v40, %v851_v39  ;;  %v915_v36 = vld [vmem:[#allocation8 + $0xa08] sm:$0xff] }
 0x217   : > { %1217 = vmatmul.mubr.f32.vlgmr.msra.gmra.mrb[2].mxu1 %v2590_v15  ;;  %1931 = vmatprep.subr.bf16.mxu0 %v1930_v45  ;;  %v861_v45 = vld [vmem:[#allocation8 + $0x858] sm:$0xff]  ;;  %v1824_v50 = vpack.c.bf16 %v854_v43, %v848_v42  ;;  %v904_v39 = vld [vmem:[#allocation8 + $0x9b0] sm:$0xff] }
 0x218   : > { %1805 = vmatpush1.bf16.msra.mxu1 %v1804_v48  ;;  %1287 = vmatprep.mubr.f32.mxu1 %v2594_v31  ;;  %v850_v48 = vld [vmem:[#allocation8 + $0x800] sm:$0xff]  ;;  %v1826_v54 = vpack.c.bf16 %v867_v46, %v861_v45  ;;  %v917_v42 = vld [vmem:[#allocation8 + $0xa18] sm:$0xff] }
 0x219   : > { %1359 = vmatmul.mubr.f32.vlgmr.msra.gmra.mrb[2].mxu0 %v2590_v15  ;;  %1807 = vmatprep.subr.bf16.mxu1 %v1806_v51  ;;  %v1814_v15 = vpack.c.bf16 %v831_v5, %v825_v4  ;;  %v863_v51 = vld [vmem:[#allocation8 + $0x868] sm:$0xff]  ;;  %v1952_v57 = vpack.c.bf16 %v856_v49, %v850_v48  ;;  %v878_v4 = vld [vmem:[#allocation8 + $0x8e0] sm:$0xff] }
 0x21a   : > { %1933 = vmatpush1.bf16.msra.mxu0 %v1932_v55  ;;  %1429 = vmatprep.mubr.f32.mxu0 %v2594_v31  ;;  %v1942_v31 = vpack.c.bf16 %v833_v11, %v827_v10  ;;  %v860_v55 = vld [vmem:[#allocation8 + $0x850] sm:$0xff]  ;;  %v1954_v60 = vpack.c.bf16 %v869_v52, %v863_v51  ;;  %v914_v45 = vld [vmem:[#allocation8 + $0xa00] sm:$0xff]  ;;  %v927_v48 = vld [vmem:[#allocation8 + $0xa68] sm:$0xff] }
 0x21b   : > { %1935 = vmatprep.subr.bf16.mxu0 %v1934_v58  ;;  %v873_v58 = vld [vmem:[#allocation8 + $0x8b8] sm:$0xff]  ;;  %v1828_v63 = vpack.c.bf16 %v866_v56, %v860_v55  ;;  %v880_v10 = vld [vmem:[#allocation8 + $0x8f0] sm:$0xff] }
 0x21c   : > { %1809 = vmatpush1.bf16.msra.mxu1 %v1808_v61  ;;  %v862_v61 = vld [vmem:[#allocation8 + $0x860] sm:$0xff]  ;;  %v1830_v2 = vpack.c.bf16 %v879_v59, %v873_v58  ;;  %v916_v51 = vld [vmem:[#allocation8 + $0xa10] sm:$0xff]  ;;  %v929_v55 = vld [vmem:[#allocation8 + $0xa78] sm:$0xff] }
 0x21d   : > { %1811 = vmatprep.subr.bf16.mxu1 %v1810_v0  ;;  %v875_v0 = vld [vmem:[#allocation8 + $0x8c8] sm:$0xff]  ;;  %v1956_v5 = vpack.c.bf16 %v868_v62, %v862_v61  ;;  %v926_v58 = vld [vmem:[#allocation8 + $0xa60] sm:$0xff] }
 0x21e   : > { %1937 = vmatpush1.bf16.msra.mxu0 %v1936_v3  ;;  %v872_v3 = vld [vmem:[#allocation8 + $0x8b0] sm:$0xff]  ;;  %v1958_v8 = vpack.c.bf16 %v881_v1, %v875_v0  ;;  %v939_v61 = vld [vmem:[#allocation8 + $0xac8] sm:$0xff] }
 0x21f   : > { %1939 = vmatprep.subr.bf16.mxu0 %v1938_v6  ;;  %v885_v6 = vld [vmem:[#allocation8 + $0x918] sm:$0xff]  ;;  %v1832_v11 = vpack.c.bf16 %v878_v4, %v872_v3  ;;  %v928_v0 = vld [vmem:[#allocation8 + $0xa70] sm:$0xff] }
 0x220   : > { %1813 = vmatpush1.bf16.msra.mxu1 %v1812_v9  ;;  %v874_v9 = vld [vmem:[#allocation8 + $0x8c0] sm:$0xff]  ;;  %v1834_v13 = vpack.c.bf16 %v891_v7, %v885_v6  ;;  %v941_v3 = vld [vmem:[#allocation8 + $0xad8] sm:$0xff] }
 0x221   : > { %1815 = vmatprep.subr.bf16.mxu1 %v1814_v15  ;;  %v887_v15 = vld [vmem:[#allocation8 + $0x928] sm:$0xff]  ;;  %v1960_v17 = vpack.c.bf16 %v880_v10, %v874_v9  ;;  %v938_v6 = vld [vmem:[#allocation8 + $0xac0] sm:$0xff] }
 0x222   : > { %1941 = vmatpush1.bf16.msra.mxu0 %v1940_v14  ;;  %v884_v14 = vld [vmem:[#allocation8 + $0x910] sm:$0xff]  ;;  %v1962_v19 = vpack.c.bf16 %v893_v12, %v887_v15  ;;  %v951_v9 = vld [vmem:[#allocation8 + $0xb28] sm:$0xff] }
 0x223   : > { %1943 = vmatprep.subr.bf16.mxu0 %v1942_v31  ;;  %v897_v31 = vld [vmem:[#allocation8 + $0x978] sm:$0xff]  ;;  %v1836_v26 = vpack.c.bf16 %v890_v16, %v884_v14  ;;  %v940_v15 = vld [vmem:[#allocation8 + $0xad0] sm:$0xff] }
 0x224   : > { %1817 = vmatpush1.bf16.msra.mxu1 %v1816_v20  ;;  %v886_v20 = vld [vmem:[#allocation8 + $0x920] sm:$0xff]  ;;  %v1838_v30 = vpack.c.bf16 %v903_v18, %v897_v31  ;;  %v953_v14 = vld [vmem:[#allocation8 + $0xb38] sm:$0xff] }
 0x225   : > { %1819 = vmatprep.subr.bf16.mxu1 %v1818_v28  ;;  %v899_v28 = vld [vmem:[#allocation8 + $0x988] sm:$0xff]  ;;  %v1964_v34 = vpack.c.bf16 %v892_v21, %v886_v20  ;;  %v950_v31 = vld [vmem:[#allocation8 + $0xb20] sm:$0xff] }
 0x226   : > { %1945 = vmatpush1.bf16.msra.mxu0 %v1944_v32  ;;  %v896_v32 = vld [vmem:[#allocation8 + $0x970] sm:$0xff]  ;;  %v1966_v37 = vpack.c.bf16 %v905_v29, %v899_v28  ;;  %v963_v20 = vld [vmem:[#allocation8 + $0xb88] sm:$0xff] }
 0x227   : > { %1947 = vmatprep.subr.bf16.mxu0 %v1946_v35  ;;  %v909_v35 = vld [vmem:[#allocation8 + $0x9d8] sm:$0xff]  ;;  %v1840_v40 = vpack.c.bf16 %v902_v33, %v896_v32  ;;  %v952_v28 = vld [vmem:[#allocation8 + $0xb30] sm:$0xff] }
 0x228   : > { %1821 = vmatpush1.bf16.msra.mxu1 %v1820_v38  ;;  %v898_v38 = vld [vmem:[#allocation8 + $0x980] sm:$0xff]  ;;  %v1842_v43 = vpack.c.bf16 %v915_v36, %v909_v35  ;;  %v965_v32 = vld [vmem:[#allocation8 + $0xb98] sm:$0xff] }
 0x229   : > { %1823 = vmatprep.subr.bf16.mxu1 %v1822_v41  ;;  %v911_v41 = vld [vmem:[#allocation8 + $0x9e8] sm:$0xff]  ;;  %v1968_v46 = vpack.c.bf16 %v904_v39, %v898_v38  ;;  %v962_v35 = vld [vmem:[#allocation8 + $0xb80] sm:$0xff] }
 0x22a   : > { %1949 = vmatpush1.bf16.msra.mxu0 %v1948_v44  ;;  %v908_v44 = vld [vmem:[#allocation8 + $0x9d0] sm:$0xff]  ;;  %v1970_v49 = vpack.c.bf16 %v917_v42, %v911_v41  ;;  %v975_v38 = vld [vmem:[#allocation8 + $0xbe8] sm:$0xff] }
 0x22b   : > { %1951 = vmatprep.subr.bf16.mxu0 %v1950_v47  ;;  %v921_v47 = vld [vmem:[#allocation8 + $0xa38] sm:$0xff]  ;;  %v1844_v52 = vpack.c.bf16 %v914_v45, %v908_v44  ;;  %v964_v41 = vld [vmem:[#allocation8 + $0xb90] sm:$0xff] }
 0x22c   : > { %1825 = vmatpush1.bf16.msra.mxu1 %v1824_v50  ;;  %v910_v50 = vld [vmem:[#allocation8 + $0x9e0] sm:$0xff]  ;;  %v1846_v56 = vpack.c.bf16 %v927_v48, %v921_v47  ;;  %v977_v44 = vld [vmem:[#allocation8 + $0xbf8] sm:$0xff] }
 0x22d   : > { %1827 = vmatprep.subr.bf16.mxu1 %v1826_v54  ;;  %v923_v54 = vld [vmem:[#allocation8 + $0xa48] sm:$0xff]  ;;  %v1972_v59 = vpack.c.bf16 %v916_v51, %v910_v50  ;;  %v974_v47 = vld [vmem:[#allocation8 + $0xbe0] sm:$0xff]  ;;  %v976_v51 = vld [vmem:[#allocation8 + $0xbf0] sm:$0xff] }
 0x22e   : > { %1953 = vmatpush1.bf16.msra.mxu0 %v1952_v57  ;;  %v920_v57 = vld [vmem:[#allocation8 + $0xa30] sm:$0xff]  ;;  %v1974_v62 = vpack.c.bf16 %v929_v55, %v923_v54  ;;  %v970_v50 = vld [vmem:[#allocation8 + $0xbc0] sm:$0xff] }
 0x22f   : > { %1955 = vmatprep.subr.bf16.mxu0 %v1954_v60  ;;  %v933_v60 = vld [vmem:[#allocation8 + $0xa98] sm:$0xff]  ;;  %v1848_v1 = vpack.c.bf16 %v926_v58, %v920_v57  ;;  %v1992_v54 = vpack.c.bf16 %v976_v51, %v970_v50  ;;  %v978_v55 = vld [vmem:[#allocation9] sm:$0x3f] }
 0x230   : > { %1829 = vmatpush1.bf16.msra.mxu1 %v1828_v63  ;;  %v922_v63 = vld [vmem:[#allocation8 + $0xa40] sm:$0xff]  ;;  %v1850_v4 = vpack.c.bf16 %v939_v61, %v933_v60  ;;  %v987_v57 = vrot.slane %v978_v55, %v2566_v23  ;;  %v995_v23 = vrot.slane %v978_v55, %v2572_v25 }
 0x231   : > { %1831 = vmatprep.subr.bf16.mxu1 %v1830_v2  ;;  %v935_v2 = vld [vmem:[#allocation8 + $0xaa8] sm:$0xff]  ;;  %v1976_v7 = vpack.c.bf16 %v928_v0, %v922_v63 }
 0x232   : > { %1957 = vmatpush1.bf16.msra.mxu0 %v1956_v5  ;;  %v932_v5 = vld [vmem:[#allocation8 + $0xa90] sm:$0xff]  ;;  %v1978_v10 = vpack.c.bf16 %v941_v3, %v935_v2  ;;  %v991_v2 = vrot.slane %v978_v55, %v2569_v24 }
 0x233   : > { %1959 = vmatprep.subr.bf16.mxu0 %v1958_v8  ;;  %v945_v8 = vld [vmem:[#allocation8 + $0xaf8] sm:$0xff]  ;;  %v1852_v12 = vpack.c.bf16 %v938_v6, %v932_v5 }
 0x234   : > { %1833 = vmatpush1.bf16.msra.mxu1 %v1832_v11  ;;  %v934_v11 = vld [vmem:[#allocation8 + $0xaa0] sm:$0xff]  ;;  %v1854_v16 = vpack.c.bf16 %v951_v9, %v945_v8 }
 0x235   : > { %1835 = vmatprep.subr.bf16.mxu1 %v1834_v13  ;;  %v947_v13 = vld [vmem:[#allocation8 + $0xb08] sm:$0xff]  ;;  %v1980_v18 = vpack.c.bf16 %v940_v15, %v934_v11 }
 0x236   : > { %1961 = vmatpush1.bf16.msra.mxu0 %v1960_v17  ;;  %v944_v17 = vld [vmem:[#allocation8 + $0xaf0] sm:$0xff]  ;;  %v1982_v21 = vpack.c.bf16 %v953_v14, %v947_v13 }
 0x237   : > { %1963 = vmatprep.subr.bf16.mxu0 %v1962_v19  ;;  %v957_v19 = vld [vmem:[#allocation8 + $0xb58] sm:$0xff]  ;;  %v1856_v29 = vpack.c.bf16 %v950_v31, %v944_v17 }
 0x238   : > { %1837 = vmatpush1.bf16.msra.mxu1 %v1836_v26  ;;  %v946_v26 = vld [vmem:[#allocation8 + $0xb00] sm:$0xff]  ;;  %v1858_v33 = vpack.c.bf16 %v963_v20, %v957_v19 }
 0x239   : > { %1839 = vmatprep.subr.bf16.mxu1 %v1838_v30  ;;  %v959_v30 = vld [vmem:[#allocation8 + $0xb68] sm:$0xff]  ;;  %v1984_v36 = vpack.c.bf16 %v952_v28, %v946_v26 }
 0x23a   : > { %1965 = vmatpush1.bf16.msra.mxu0 %v1964_v34  ;;  %v956_v34 = vld [vmem:[#allocation8 + $0xb50] sm:$0xff]  ;;  %v1986_v39 = vpack.c.bf16 %v965_v32, %v959_v30 }
 0x23b   : > { %1967 = vmatprep.subr.bf16.mxu0 %v1966_v37  ;;  %v969_v37 = vld [vmem:[#allocation8 + $0xbb8] sm:$0xff]  ;;  %v1860_v42 = vpack.c.bf16 %v962_v35, %v956_v34 }
 0x23c   : > { %1841 = vmatpush1.bf16.msra.mxu1 %v1840_v40  ;;  %v958_v40 = vld [vmem:[#allocation8 + $0xb60] sm:$0xff]  ;;  %v1862_v45 = vpack.c.bf16 %v975_v38, %v969_v37 }
 0x23d   : > { %1843 = vmatprep.subr.bf16.mxu1 %v1842_v43  ;;  %v971_v43 = vld [vmem:[#allocation8 + $0xbc8] sm:$0xff]  ;;  %v1988_v48 = vpack.c.bf16 %v964_v41, %v958_v40 }
 0x23e   : > { %1969 = vmatpush1.bf16.msra.mxu0 %v1968_v46  ;;  %v968_v46 = vld [vmem:[#allocation8 + $0xbb0] sm:$0xff] }
 0x23f   : > { %1971 = vmatprep.subr.bf16.mxu0 %v1970_v49  ;;  %v1990_v49 = vpack.c.bf16 %v977_v44, %v971_v43 }
 0x240   : > { %1845 = vmatpush1.bf16.msra.mxu1 %v1844_v52  ;;  %v1864_v52 = vpack.c.bf16 %v974_v47, %v968_v46 }
 0x241   : > { %1847 = vmatprep.subr.bf16.mxu1 %v1846_v56  ;;  %v983_v56 = vrot.slane %v978_v55, %v2563_v22  ;;  %v1002_v22 = vsub.s32 5, %v2558_v53 }
 0x242   : > { %1973 = vmatpush1.bf16.msra.mxu0 %v1972_v59 }
 0x243   : > { %1975 = vmatprep.subr.bf16.mxu0 %v1974_v62  ;;  %v1003_v5 = vrot.slane %v978_v55, %v1002_v22 }
 0x244   : > { %1849 = vmatpush1.bf16.msra.mxu1 %v1848_v1 }
 0x245   : > { %1851 = vmatprep.subr.bf16.mxu1 %v1850_v4 }
 0x246   : > { %1977 = vmatpush1.bf16.msra.mxu0 %v1976_v7 }
 0x247   : > { %1979 = vmatprep.subr.bf16.mxu0 %v1978_v10 }
 0x248   : > { %1853 = vmatpush1.bf16.msra.mxu1 %v1852_v12 }
 0x249   : > { %1855 = vmatprep.subr.bf16.mxu1 %v1854_v16 }
 0x24a   : > { %1981 = vmatpush1.bf16.msra.mxu0 %v1980_v18 }
 0x24b   : > { %1983 = vmatprep.subr.bf16.mxu0 %v1982_v21 }
 0x24c   : > { %1857 = vmatpush1.bf16.msra.mxu1 %v1856_v29 }
 0x24d   : > { %1859 = vmatprep.subr.bf16.mxu1 %v1858_v33 }
 0x24e   : > { %1985 = vmatpush1.bf16.msra.mxu0 %v1984_v36 }
 0x24f   : > { %1987 = vmatprep.subr.bf16.mxu0 %v1986_v39 }
 0x250   : > { %1861 = vmatpush1.bf16.msra.mxu1 %v1860_v42 }
 0x251   : > { %1863 = vmatprep.subr.bf16.mxu1 %v1862_v45 }
 0x252   : > { %1989 = vmatpush1.bf16.msra.mxu0 %v1988_v48 }
 0x253   : > { %1991 = vmatprep.subr.bf16.mxu0 %v1990_v49 }
 0x254   : > { %1865 = vmatpush1.bf16.msra.mxu1 %v1864_v52 }
 0x256   : > { %1993 = vmatpush1.bf16.msra.mxu0 %v1992_v54 }
 0x257   : > { %1288 = vmatmul.mubr.f32.vlgmr.msra.gmra.mrb[2].mxu1 %v2592_v27 }
 0x259   : > { %1430 = vmatmul.mubr.f32.vlgmr.msra.gmra.mrb[2].mxu0 %v2592_v27  ;;  %v998_v27 = vsub.s32 4, %v2558_v53 }
 0x25b   : > { %v999_v3 = vrot.slane %v978_v55, %v998_v27 }
 0x2aa   : > { %v1076_v58 = vpop.f32.mrb[0].mxu1 }
 0x2ab   : > { %v1077_v59 = vadd.f32 %v1076_v58, %v983_v56  ;;  %v1078_v60 = vpop.f32.mrb[1].mxu1 }
 0x2ac   : > { %v1147_v61 = vpop.f32.mrb[0].mxu0  ;;  %v1079_v62 = vadd.f32 %v1078_v60, %v987_v57 }
 0x2ad   : > { %v1148_v63 = vadd.f32 %v1147_v61, %v1077_v59  ;;  %v1149_v0 = vpop.f32.mrb[1].mxu0 }
 0x2ae   : > { %v1150_v1 = vadd.f32 %v1149_v0, %v1079_v62 }
 0x2af   : > { %1436 = vst [vmem:[%s296_s15] sm:$0xff] %v1148_v63 }
 0x2b0   : > { %1437 = vst [vmem:[%s296_s15 + $0x8] sm:$0xff] %v1150_v1 }
 0x32a   : > { %v1289_v4 = vpop.f32.mrb[2].mxu1 }
 0x32b   : > { %v1998_v6 = vadd.f32 %v1289_v4, %v991_v2  ;;  %v1291_v7 = vpop.f32.mrb[3].mxu1 }
 0x32c   : > { %v1431_v8 = vpop.f32.mrb[2].mxu0  ;;  %v1999_v9 = vadd.f32 %v1291_v7, %v995_v23 }
 0x32d   : > { %1438 = vst [vmem:[%s296_s15 + $0x10] sm:$0xff] %v1998_v6  ;;  %v2000_v10 = vadd.f32 %v1431_v8, %v999_v3  ;;  %v1433_v11 = vpop.f32.mrb[3].mxu0 }
 0x32e   : > { %1439 = vst [vmem:[%s296_s15 + $0x18] sm:$0xff] %v1999_v9  ;;  %v2001_v53 = vadd.f32 %v1433_v11, %v1003_v5 }
 0x32f   : > { %1440 = vst [vmem:[%s296_s15 + $0x20] sm:$0xff] %v2000_v10 }
 0x330   : > { %1441 = vst [vmem:[%s296_s15 + $0x28] sm:$0xff] %v2001_v53 }
 0x331   : > { %2247 = shalt.err (!%p2244_p6)
}
 0x332   : > { %s2248_s14 = scalar_lea.hbm %s2618_s9, 768  ;;  %s2252_s7 = scalar_lea.hbm %s2672_s5, 1536 }
 0x333   : > { %p2249_p7 = scmp.ne.s32.totalorder %s2618_s9, %s2248_s14  ;;  %p2253_p0 = scmp.lt.u32.totalorder %s2618_s9, %s2672_s5 }
 0x334   : > { %p2254_p2 = scmp.lt.u32.totalorder %s2252_s7, %s2248_s14  ;;  %p2256_p1 = scmp.lt.u32.totalorder %s2248_s14, %s2618_s9 }
 0x335   : > { %p2250_p9 = pnand %p2249_p7, %p2691_p4 }
 0x336   : > { %p2255_p13 = por %p2254_p2, %p2253_p0 }
 0x337   : > { %p2251_p12 = pneg %p2250_p9 }
 0x338   : > { %p2257_p8 = por %p2256_p1, %p2255_p13 }
 0x33a   : > { %p2258_p10 = pnand %p2257_p8, %p2251_p12 }
 0x33c   : > { %2261 = shalt.err (!%p2258_p10)
}
 0x33d   : > { %2024 = dma.vmem_to_hbm [thread:$0]  (%p2691_p4), %s2620_s24, 768, %s2618_s9, %s1443_s21  }
 0x33e PF: > { %p2051_p11 = scmp.ge.s32.totalorder %s2324_s23, 2  ;;  %s1469_s8 = sand.u32 1, %s2304_s18  }
 0x33f   : > { %p2692_p3 = scmp.ne.s32.totalorder %s2682_s30, 0  ;;  %s1470_s2 = scalar_lea.sflag [#allocation5], %s1469_s8 }
 0x341   : > { %p2040_p5 = pnand %p2051_p11, %p2692_p3 }
 0x343   : > { %2299 = dma.done.wait (!%p2040_p5), %s1470_s2, 768  }
 0x344   : > { %2301 = vsyncadd (!%p2040_p5), %s1470_s2, 4294966528  ;;  %s21_s23 = sadd.s32 1, %s2324_s23   ;;  %s2693_s28 = sld [smem:[#allocation16_spill]] }
 0x345   : > { %p18_p6 = scmp.ge.s32.totalorder %s21_s23, 4   ;;  %s2694_s18 = smov %s2308_s19 }
 0x346   : > { %s2695_s19 = smov %s2312_s20  ;;  %s2696_s20 = smov %s2420_s6 }
 0x347   : > { %s2697_s21 = smov %s2320_s22  ;;  %20 = sbr.rel (!%p18_p6) target bundleno = 10 (0xa), region = 102 }
 0x34a   : > { %s2698_s22 = smov %s2693_s28 }
 0x34e   :  { %1475 = vsyncpa [#allocation4], 1 }
 0x34f   :  { %1477 = vsyncpa [#allocation4 + $0x1], 1 }
 0x350   :  { %1478 = vsyncpa [#allocation7], 1 }
 0x351   :  { %1479 = vsyncpa [#allocation10], 1 }
 0x352   :  { %1480 = vsyncpa [#allocation5], 1 }
 0x353   :  { %1482 = vsyncpa [#allocation5 + $0x1], 1 }

</bundles_post_ra>
